<compile_context>
chip_gen: v7x
topology: tpu7x:2x2x1
jax: 0.10.0
libtpu: 0.0.40
codegen_flags: <defaults>
</compile_context>

<pallas_src>
import functools

import numpy as np

import jax
import jax.numpy as jnp
from jax.experimental import pallas as pl
from jax.experimental.pallas import tpu as pltpu


def _cbam_fused_kernel(x_ref, w1t_ref, b1_ref, w2_ref, b2_ref, wp_ref, out_ref,
                       *, H, W, K):
    HW = H * W
    P = (K - 1) // 2
    f32 = jnp.float32

    # (C, H*W) lane-dense view of this batch element; all math in f32.
    xb = x_ref[0].astype(f32)

    # ---------------- Channel gate ----------------
    avg = jnp.mean(xb, axis=1, keepdims=True)          # (C, 1) global avg pool
    mx = jnp.max(xb, axis=1, keepdims=True)            # (C, 1) global max pool

    w1t = w1t_ref[...]                                 # (C, hid)  == w1.T
    b1 = b1_ref[...]                                   # (1, hid)
    w2 = w2_ref[...]                                   # (C, hid)
    b2 = b2_ref[...]                                   # (C, 1)

    # Shared 2-layer MLP on both pooled vectors.  Contractions are done on the
    # VPU/XLU (exact f32) — the shapes are degenerate for the MXU.
    h_a = jnp.maximum(jnp.sum(w1t * avg, axis=0, keepdims=True) + b1, 0.0)   # (1, hid)
    h_m = jnp.maximum(jnp.sum(w1t * mx, axis=0, keepdims=True) + b1, 0.0)    # (1, hid)
    # mlp(avg) + mlp(max) = w2 @ (relu_a + relu_m) + 2*b2
    att = jnp.sum(w2 * (h_a + h_m), axis=1, keepdims=True) + 2.0 * b2        # (C, 1)
    c_scale = jax.nn.sigmoid(att)                      # (C, 1)

    xc = xb * c_scale                                  # (C, HW) channel-gated

    # ---------------- ChannelPool (max / mean over C), sublane-packed ----------------
    pmax = jnp.max(xc, axis=0, keepdims=True)          # (1, HW)
    pmean = jnp.mean(xc, axis=0, keepdims=True)        # (1, HW)
    rowsel = jax.lax.broadcasted_iota(jnp.int32, (2, HW), 0)
    pooled2 = jnp.where(rowsel == 0, pmax, pmean)      # (2, HW): row0=max, row1=mean

    # ---------------- 7x7 "same" conv on flattened lanes ----------------
    # out[p] = sum_{c,ky,kx} wplane[c,ky,kx,p] * pooled2[c, (p + dy*W + dx) mod HW]
    # wplane already contains weight * validity-mask (zero padding), so the tap
    # body is roll (XLU) + mul + add (VPU).  4 partial accumulators break the
    # 49-long dependence chain.
    n_acc = 4
    accs = [jnp.zeros((2, HW), f32) for _ in range(n_acc)]
    for t in range(K * K):
        ky, kx = divmod(t, K)
        off = (ky - P) * W + (kx - P)
        shifted = pltpu.roll(pooled2, (-off) % HW, 1) if off != 0 else pooled2
        w_tap = wp_ref[pl.ds(2 * t, 2), :]             # (2, HW) masked weights
        accs[t % n_acc] = accs[t % n_acc] + w_tap * shifted
    acc2 = (accs[0] + accs[1]) + (accs[2] + accs[3])   # (2, HW)
    conv = jnp.sum(acc2, axis=0, keepdims=True)        # (1, HW) sum over [max, mean]

    lrelu = jnp.where(conv >= 0.0, conv, 0.1 * conv)   # LeakyReLU(0.1), bn=False
    s_scale = jax.nn.sigmoid(lrelu)                    # (1, HW)

    out_ref[0] = (xc * s_scale).astype(out_ref.dtype)


def cbam_pallas(x, params, *, reduction_ratio=16):
    B, C, H, W = x.shape
    hid = C // reduction_ratio
    w1, b1, w2, b2, cw = params          # (hid,C), (hid,), (C,hid), (C,), (2,K,K)
    K = cw.shape[-1]
    P = (K - 1) // 2
    HW = H * W

    x_flat = x.reshape(B, C, HW)         # free reshape for contiguous NCHW

    # Parameter layouts the kernel wants (no in-kernel transposes).
    w1t = jnp.asarray(w1, jnp.float32).T                 # (C, hid)
    b1r = jnp.asarray(b1, jnp.float32).reshape(1, hid)   # (1, hid)
    w2f = jnp.asarray(w2, jnp.float32)                   # (C, hid)
    b2c = jnp.asarray(b2, jnp.float32).reshape(C, 1)     # (C, 1)

    # Precompute masked per-tap weight planes: wplanes[2t+c, p] =
    #   cw[c, ky, kx] if the tap (ky,kx) at output pixel p stays inside the
    #   image ("same" zero padding), else 0.  Static mask built with numpy.
    rows = np.arange(HW) // W
    cols = np.arange(HW) % W
    mask = np.zeros((K * K, HW), np.float32)
    for ky in range(K):
        for kx in range(K):
            dy, dx = ky - P, kx - P
            ok = ((rows + dy >= 0) & (rows + dy < H) &
                  (cols + dx >= 0) & (cols + dx < W))
            mask[ky * K + kx] = ok
    wtap = jnp.asarray(cw, jnp.float32).reshape(2, K * K).T      # (K*K, 2)
    wplanes = (jnp.asarray(mask)[:, None, :] * wtap[:, :, None]
               ).reshape(2 * K * K, HW)                          # (2*K*K, HW)

    itemsize = jnp.dtype(x.dtype).itemsize
    param_bytes = 4 * (w1t.size + b1r.size + w2f.size + b2c.size + wplanes.size)
    cost = pl.CostEstimate(
        flops=int(B * (6 * hid * C                  # two-layer MLP on 2 pooled vecs
                       + 2 * 2 * K * K * HW         # 49-tap conv on 2 channels
                       + 4 * C * HW)),              # pools + channel/spatial scaling
        transcendentals=int(B * (C + HW)),          # sigmoids
        bytes_accessed=int(2 * B * C * HW * itemsize + param_bytes),
    )

    y_flat = pl.pallas_call(
        functools.partial(_cbam_fused_kernel, H=H, W=W, K=K),
        grid=(B,),
        in_specs=[
            pl.BlockSpec((1, C, HW), lambda b: (b, 0, 0)),
            pl.BlockSpec((C, hid), lambda b: (0, 0)),
            pl.BlockSpec((1, hid), lambda b: (0, 0)),
            pl.BlockSpec((C, hid), lambda b: (0, 0)),
            pl.BlockSpec((C, 1), lambda b: (0, 0)),
            pl.BlockSpec((2 * K * K, HW), lambda b: (0, 0)),
        ],
        out_specs=pl.BlockSpec((1, C, HW), lambda b: (b, 0, 0)),
        out_shape=jax.ShapeDtypeStruct((B, C, HW), x.dtype),
        compiler_params=pltpu.CompilerParams(dimension_semantics=("parallel",)),
        cost_estimate=cost,
    )(x_flat, w1t, b1r, w2f, b2c, wplanes)

    return y_flat.reshape(B, C, H, W)


def cbam_ref(x, params):
    """Pure-JAX reference mirroring the PyTorch forward exactly."""
    w1, b1, w2, b2, cw = params
    hp = jax.lax.Precision.HIGHEST
    avg = jnp.mean(x, axis=(2, 3))
    mx = jnp.max(x, axis=(2, 3))

    def mlp(v):
        h = jnp.maximum(jnp.dot(v, w1.T, precision=hp) + b1, 0.0)
        return jnp.dot(h, w2.T, precision=hp) + b2

    att = mlp(avg) + mlp(mx)
    scale = jax.nn.sigmoid(att)[:, :, None, None]
    xc = x * scale
    pooled = jnp.concatenate(
        [jnp.max(xc, axis=1, keepdims=True), jnp.mean(xc, axis=1, keepdims=True)],
        axis=1)
    pad = (cw.shape[-1] - 1) // 2
    conv = jax.lax.conv_general_dilated(
        pooled, cw[None], window_strides=(1, 1), padding=[(pad, pad), (pad, pad)],
        dimension_numbers=("NCHW", "OIHW", "NCHW"), precision=hp)
    lrelu = jnp.where(conv >= 0.0, conv, 0.1 * conv)
    return xc * jax.nn.sigmoid(lrelu)


if __name__ == "__main__":
    B, C, H, W = 2, 32, 16, 16
    reduction_ratio = 16
    hid = C // reduction_ratio
    K = 7

    key = jax.random.PRNGKey(0)
    kx, k1, k2, k3, k4, k5 = jax.random.split(key, 6)
    x = jax.random.normal(kx, (B, C, H, W), jnp.float32)
    # Deterministic synthetic parameters (shapes from the module's __init__).
    w1 = jax.random.normal(k1, (hid, C), jnp.float32) * 0.2    # Linear(C -> C//r)
    b1 = jax.random.normal(k2, (hid,), jnp.float32) * 0.1
    w2 = jax.random.normal(k3, (C, hid), jnp.float32) * 0.2    # Linear(C//r -> C)
    b2 = jax.random.normal(k4, (C,), jnp.float32) * 0.1
    cw = jax.random.normal(k5, (2, K, K), jnp.float32) * 0.1   # Conv2d(2,1,7), no bias
    params = (w1, b1, w2, b2, cw)

    y = cbam_pallas(x, params, reduction_ratio=reduction_ratio)
    y = jax.block_until_ready(y)

    y_ref = cbam_ref(x, params)
    if not bool(jnp.allclose(y, y_ref, rtol=1e-4, atol=1e-4)):
        err = float(jnp.max(jnp.abs(y - y_ref)))
        raise AssertionError(f"Pallas CBAM output mismatch vs reference (max abs err {err})")

    print("KERNEL_OK")
</pallas_src>

<mosaic_0001>
module attributes {stable_mosaic.version = 11 : i64} {
  func.func @_cbam_fused_kernel(%arg0: i32, %arg1: memref<1x32x256xf32, #tpu.memory_space<vmem>>, %arg2: memref<32x2xf32, #tpu.memory_space<vmem>>, %arg3: memref<1x2xf32, #tpu.memory_space<vmem>>, %arg4: memref<32x2xf32, #tpu.memory_space<vmem>>, %arg5: memref<32x1xf32, #tpu.memory_space<vmem>>, %arg6: memref<98x256xf32, #tpu.memory_space<vmem>>, %arg7: memref<1x32x256xf32, #tpu.memory_space<vmem>>) attributes {dimension_semantics = [#tpu.dimension_semantics<parallel>], iteration_bounds = array<i64: 2>, scalar_prefetch = 0 : i64, scratch_operands = 0 : i64, tpu.core_type = #tpu.core_type<tc>, window_params = [{transform_indices = @transform_0, window_bounds = array<i64: 1, 32, 256>}, {pipeline_mode = #tpu.pipeline_mode<synchronous>, transform_indices = @transform_1, window_bounds = array<i64: 32, 2>}, {pipeline_mode = #tpu.pipeline_mode<synchronous>, transform_indices = @transform_2, window_bounds = array<i64: 1, 2>}, {pipeline_mode = #tpu.pipeline_mode<synchronous>, transform_indices = @transform_3, window_bounds = array<i64: 32, 2>}, {pipeline_mode = #tpu.pipeline_mode<synchronous>, transform_indices = @transform_4, window_bounds = array<i64: 32, 1>}, {pipeline_mode = #tpu.pipeline_mode<synchronous>, transform_indices = @transform_5, window_bounds = array<i64: 98, 256>}, {transform_indices = @transform_6, window_bounds = array<i64: 1, 32, 256>}]} {
    %c0 = arith.constant 0 : index
    %c0_0 = arith.constant 0 : index
    %c0_1 = arith.constant 0 : index
    %0 = vector.load %arg1[%c0, %c0_0, %c0_1] : memref<1x32x256xf32, #tpu.memory_space<vmem>>, vector<1x32x256xf32>
    %1 = vector.shape_cast %0 : vector<1x32x256xf32> to vector<32x256xf32>
    %cst = arith.constant dense<0.000000e+00> : vector<32xf32>
    %2 = vector.multi_reduction <add>, %1, %cst [1] : vector<32x256xf32> to vector<32xf32>
    %3 = vector.shape_cast %2 : vector<32xf32> to vector<32x1xf32>
    %cst_2 = arith.constant 2.560000e+02 : f32
    %4 = vector.broadcast %cst_2 : f32 to vector<32x1xf32>
    %5 = arith.divf %3, %4 : vector<32x1xf32>
    %cst_3 = arith.constant dense<0xFF800000> : vector<32xf32>
    %6 = vector.multi_reduction <maximumf>, %1, %cst_3 [1] : vector<32x256xf32> to vector<32xf32>
    %7 = vector.shape_cast %6 : vector<32xf32> to vector<32x1xf32>
    %c0_4 = arith.constant 0 : index
    %c0_5 = arith.constant 0 : index
    %8 = vector.load %arg2[%c0_4, %c0_5] : memref<32x2xf32, #tpu.memory_space<vmem>>, vector<32x2xf32>
    %c0_6 = arith.constant 0 : index
    %c0_7 = arith.constant 0 : index
    %9 = vector.load %arg3[%c0_6, %c0_7] : memref<1x2xf32, #tpu.memory_space<vmem>>, vector<1x2xf32>
    %c0_8 = arith.constant 0 : index
    %c0_9 = arith.constant 0 : index
    %10 = vector.load %arg4[%c0_8, %c0_9] : memref<32x2xf32, #tpu.memory_space<vmem>>, vector<32x2xf32>
    %c0_10 = arith.constant 0 : index
    %c0_11 = arith.constant 0 : index
    %11 = vector.load %arg5[%c0_10, %c0_11] : memref<32x1xf32, #tpu.memory_space<vmem>>, vector<32x1xf32>
    %12 = vector.broadcast %5 : vector<32x1xf32> to vector<32x2xf32>
    %13 = arith.mulf %8, %12 : vector<32x2xf32>
    %cst_12 = arith.constant dense<0.000000e+00> : vector<2xf32>
    %14 = vector.multi_reduction <add>, %13, %cst_12 [0] : vector<32x2xf32> to vector<2xf32>
    %15 = vector.shape_cast %14 : vector<2xf32> to vector<1x2xf32>
    %16 = arith.addf %15, %9 : vector<1x2xf32>
    %cst_13 = arith.constant 0.000000e+00 : f32
    %17 = vector.broadcast %cst_13 : f32 to vector<1x2xf32>
    %18 = arith.maximumf %16, %17 : vector<1x2xf32>
    %19 = vector.broadcast %7 : vector<32x1xf32> to vector<32x2xf32>
    %20 = arith.mulf %8, %19 : vector<32x2xf32>
    %cst_14 = arith.constant dense<0.000000e+00> : vector<2xf32>
    %21 = vector.multi_reduction <add>, %20, %cst_14 [0] : vector<32x2xf32> to vector<2xf32>
    %22 = vector.shape_cast %21 : vector<2xf32> to vector<1x2xf32>
    %23 = arith.addf %22, %9 : vector<1x2xf32>
    %cst_15 = arith.constant 0.000000e+00 : f32
    %24 = vector.broadcast %cst_15 : f32 to vector<1x2xf32>
    %25 = arith.maximumf %23, %24 : vector<1x2xf32>
    %26 = arith.addf %18, %25 : vector<1x2xf32>
    %27 = vector.broadcast %26 : vector<1x2xf32> to vector<32x2xf32>
    %28 = arith.mulf %10, %27 : vector<32x2xf32>
    %cst_16 = arith.constant dense<0.000000e+00> : vector<32xf32>
    %29 = vector.multi_reduction <add>, %28, %cst_16 [1] : vector<32x2xf32> to vector<32xf32>
    %30 = vector.shape_cast %29 : vector<32xf32> to vector<32x1xf32>
    %cst_17 = arith.constant 2.000000e+00 : f32
    %31 = vector.broadcast %cst_17 : f32 to vector<32x1xf32>
    %32 = arith.mulf %31, %11 : vector<32x1xf32>
    %33 = arith.addf %30, %32 : vector<32x1xf32>
    %34 = arith.negf %33 : vector<32x1xf32>
    %35 = math.exp %34 : vector<32x1xf32>
    %cst_18 = arith.constant 1.000000e+00 : f32
    %36 = vector.broadcast %cst_18 : f32 to vector<32x1xf32>
    %37 = arith.addf %36, %35 : vector<32x1xf32>
    %38 = arith.divf %36, %37 : vector<32x1xf32>
    %39 = vector.broadcast %38 : vector<32x1xf32> to vector<32x256xf32>
    %40 = arith.mulf %1, %39 : vector<32x256xf32>
    %cst_19 = arith.constant dense<0xFF800000> : vector<256xf32>
    %41 = vector.multi_reduction <maximumf>, %40, %cst_19 [0] : vector<32x256xf32> to vector<256xf32>
    %42 = vector.shape_cast %41 : vector<256xf32> to vector<1x256xf32>
    %cst_20 = arith.constant dense<0.000000e+00> : vector<256xf32>
    %43 = vector.multi_reduction <add>, %40, %cst_20 [0] : vector<32x256xf32> to vector<256xf32>
    %44 = vector.shape_cast %43 : vector<256xf32> to vector<1x256xf32>
    %cst_21 = arith.constant 3.200000e+01 : f32
    %45 = vector.broadcast %cst_21 : f32 to vector<1x256xf32>
    %46 = arith.divf %44, %45 : vector<1x256xf32>
    %47 = tpu.iota {dimensions = array<i32: 0>} : vector<2x256xi32>
    %c0_i32 = arith.constant 0 : i32
    %48 = vector.broadcast %c0_i32 : i32 to vector<2x256xi32>
    %49 = arith.cmpi eq, %47, %48 : vector<2x256xi32>
    %50 = vector.shape_cast %42 : vector<1x256xf32> to vector<1x256xf32>
    %51 = vector.broadcast %50 : vector<1x256xf32> to vector<2x256xf32>
    %52 = vector.shape_cast %46 : vector<1x256xf32> to vector<1x256xf32>
    %53 = vector.broadcast %52 : vector<1x256xf32> to vector<2x256xf32>
    %54 = arith.select %49, %51, %53 : vector<2x256xi1>, vector<2x256xf32>
    %cst_22 = arith.constant 0.000000e+00 : f32
    %55 = vector.broadcast %cst_22 : f32 to vector<2x256xf32>
    %cst_23 = arith.constant 0.000000e+00 : f32
    %56 = vector.broadcast %cst_23 : f32 to vector<2x256xf32>
    %cst_24 = arith.constant 0.000000e+00 : f32
    %57 = vector.broadcast %cst_24 : f32 to vector<2x256xf32>
    %cst_25 = arith.constant 0.000000e+00 : f32
    %58 = vector.broadcast %cst_25 : f32 to vector<2x256xf32>
    %c51_i32 = arith.constant 51 : i32
    %59 = tpu.dynamic_rotate %54 by %c51_i32 dim 1 : vector<2x256xf32>, i32 -> vector<2x256xf32>
    %c0_26 = arith.constant 0 : index
    %c0_27 = arith.constant 0 : index
    %60 = vector.load %arg6[%c0_26, %c0_27] : memref<98x256xf32, #tpu.memory_space<vmem>>, vector<2x256xf32>
    %61 = arith.mulf %60, %59 : vector<2x256xf32>
    %62 = arith.addf %55, %61 : vector<2x256xf32>
    %c50_i32 = arith.constant 50 : i32
    %63 = tpu.dynamic_rotate %54 by %c50_i32 dim 1 : vector<2x256xf32>, i32 -> vector<2x256xf32>
    %c2 = arith.constant 2 : index
    %c0_28 = arith.constant 0 : index
    %64 = vector.load %arg6[%c2, %c0_28] : memref<98x256xf32, #tpu.memory_space<vmem>>, vector<2x256xf32>
    %65 = arith.mulf %64, %63 : vector<2x256xf32>
    %66 = arith.addf %56, %65 : vector<2x256xf32>
    %c49_i32 = arith.constant 49 : i32
    %67 = tpu.dynamic_rotate %54 by %c49_i32 dim 1 : vector<2x256xf32>, i32 -> vector<2x256xf32>
    %c4 = arith.constant 4 : index
    %c0_29 = arith.constant 0 : index
    %68 = vector.load %arg6[%c4, %c0_29] : memref<98x256xf32, #tpu.memory_space<vmem>>, vector<2x256xf32>
    %69 = arith.mulf %68, %67 : vector<2x256xf32>
    %70 = arith.addf %57, %69 : vector<2x256xf32>
    %c48_i32 = arith.constant 48 : i32
    %71 = tpu.dynamic_rotate %54 by %c48_i32 dim 1 : vector<2x256xf32>, i32 -> vector<2x256xf32>
    %c6 = arith.constant 6 : index
    %c0_30 = arith.constant 0 : index
    %72 = vector.load %arg6[%c6, %c0_30] : memref<98x256xf32, #tpu.memory_space<vmem>>, vector<2x256xf32>
    %73 = arith.mulf %72, %71 : vector<2x256xf32>
    %74 = arith.addf %58, %73 : vector<2x256xf32>
    %c47_i32 = arith.constant 47 : i32
    %75 = tpu.dynamic_rotate %54 by %c47_i32 dim 1 : vector<2x256xf32>, i32 -> vector<2x256xf32>
    %c8 = arith.constant 8 : index
    %c0_31 = arith.constant 0 : index
    %76 = vector.load %arg6[%c8, %c0_31] : memref<98x256xf32, #tpu.memory_space<vmem>>, vector<2x256xf32>
    %77 = arith.mulf %76, %75 : vector<2x256xf32>
    %78 = arith.addf %62, %77 : vector<2x256xf32>
    %c46_i32 = arith.constant 46 : i32
    %79 = tpu.dynamic_rotate %54 by %c46_i32 dim 1 : vector<2x256xf32>, i32 -> vector<2x256xf32>
    %c10 = arith.constant 10 : index
    %c0_32 = arith.constant 0 : index
    %80 = vector.load %arg6[%c10, %c0_32] : memref<98x256xf32, #tpu.memory_space<vmem>>, vector<2x256xf32>
    %81 = arith.mulf %80, %79 : vector<2x256xf32>
    %82 = arith.addf %66, %81 : vector<2x256xf32>
    %c45_i32 = arith.constant 45 : i32
    %83 = tpu.dynamic_rotate %54 by %c45_i32 dim 1 : vector<2x256xf32>, i32 -> vector<2x256xf32>
    %c12 = arith.constant 12 : index
    %c0_33 = arith.constant 0 : index
    %84 = vector.load %arg6[%c12, %c0_33] : memref<98x256xf32, #tpu.memory_space<vmem>>, vector<2x256xf32>
    %85 = arith.mulf %84, %83 : vector<2x256xf32>
    %86 = arith.addf %70, %85 : vector<2x256xf32>
    %c35_i32 = arith.constant 35 : i32
    %87 = tpu.dynamic_rotate %54 by %c35_i32 dim 1 : vector<2x256xf32>, i32 -> vector<2x256xf32>
    %c14 = arith.constant 14 : index
    %c0_34 = arith.constant 0 : index
    %88 = vector.load %arg6[%c14, %c0_34] : memref<98x256xf32, #tpu.memory_space<vmem>>, vector<2x256xf32>
    %89 = arith.mulf %88, %87 : vector<2x256xf32>
    %90 = arith.addf %74, %89 : vector<2x256xf32>
    %c34_i32 = arith.constant 34 : i32
    %91 = tpu.dynamic_rotate %54 by %c34_i32 dim 1 : vector<2x256xf32>, i32 -> vector<2x256xf32>
    %c16 = arith.constant 16 : index
    %c0_35 = arith.constant 0 : index
    %92 = vector.load %arg6[%c16, %c0_35] : memref<98x256xf32, #tpu.memory_space<vmem>>, vector<2x256xf32>
    %93 = arith.mulf %92, %91 : vector<2x256xf32>
    %94 = arith.addf %78, %93 : vector<2x256xf32>
    %c33_i32 = arith.constant 33 : i32
    %95 = tpu.dynamic_rotate %54 by %c33_i32 dim 1 : vector<2x256xf32>, i32 -> vector<2x256xf32>
    %c18 = arith.constant 18 : index
    %c0_36 = arith.constant 0 : index
    %96 = vector.load %arg6[%c18, %c0_36] : memref<98x256xf32, #tpu.memory_space<vmem>>, vector<2x256xf32>
    %97 = arith.mulf %96, %95 : vector<2x256xf32>
    %98 = arith.addf %82, %97 : vector<2x256xf32>
    %c32_i32 = arith.constant 32 : i32
    %99 = tpu.dynamic_rotate %54 by %c32_i32 dim 1 : vector<2x256xf32>, i32 -> vector<2x256xf32>
    %c20 = arith.constant 20 : index
    %c0_37 = arith.constant 0 : index
    %100 = vector.load %arg6[%c20, %c0_37] : memref<98x256xf32, #tpu.memory_space<vmem>>, vector<2x256xf32>
    %101 = arith.mulf %100, %99 : vector<2x256xf32>
    %102 = arith.addf %86, %101 : vector<2x256xf32>
    %c31_i32 = arith.constant 31 : i32
    %103 = tpu.dynamic_rotate %54 by %c31_i32 dim 1 : vector<2x256xf32>, i32 -> vector<2x256xf32>
    %c22 = arith.constant 22 : index
    %c0_38 = arith.constant 0 : index
    %104 = vector.load %arg6[%c22, %c0_38] : memref<98x256xf32, #tpu.memory_space<vmem>>, vector<2x256xf32>
    %105 = arith.mulf %104, %103 : vector<2x256xf32>
    %106 = arith.addf %90, %105 : vector<2x256xf32>
    %c30_i32 = arith.constant 30 : i32
    %107 = tpu.dynamic_rotate %54 by %c30_i32 dim 1 : vector<2x256xf32>, i32 -> vector<2x256xf32>
    %c24 = arith.constant 24 : index
    %c0_39 = arith.constant 0 : index
    %108 = vector.load %arg6[%c24, %c0_39] : memref<98x256xf32, #tpu.memory_space<vmem>>, vector<2x256xf32>
    %109 = arith.mulf %108, %107 : vector<2x256xf32>
    %110 = arith.addf %94, %109 : vector<2x256xf32>
    %c29_i32 = arith.constant 29 : i32
    %111 = tpu.dynamic_rotate %54 by %c29_i32 dim 1 : vector<2x256xf32>, i32 -> vector<2x256xf32>
    %c26 = arith.constant 26 : index
    %c0_40 = arith.constant 0 : index
    %112 = vector.load %arg6[%c26, %c0_40] : memref<98x256xf32, #tpu.memory_space<vmem>>, vector<2x256xf32>
    %113 = arith.mulf %112, %111 : vector<2x256xf32>
    %114 = arith.addf %98, %113 : vector<2x256xf32>
    %c19_i32 = arith.constant 19 : i32
    %115 = tpu.dynamic_rotate %54 by %c19_i32 dim 1 : vector<2x256xf32>, i32 -> vector<2x256xf32>
    %c28 = arith.constant 28 : index
    %c0_41 = arith.constant 0 : index
    %116 = vector.load %arg6[%c28, %c0_41] : memref<98x256xf32, #tpu.memory_space<vmem>>, vector<2x256xf32>
    %117 = arith.mulf %116, %115 : vector<2x256xf32>
    %118 = arith.addf %102, %117 : vector<2x256xf32>
    %c18_i32 = arith.constant 18 : i32
    %119 = tpu.dynamic_rotate %54 by %c18_i32 dim 1 : vector<2x256xf32>, i32 -> vector<2x256xf32>
    %c30 = arith.constant 30 : index
    %c0_42 = arith.constant 0 : index
    %120 = vector.load %arg6[%c30, %c0_42] : memref<98x256xf32, #tpu.memory_space<vmem>>, vector<2x256xf32>
    %121 = arith.mulf %120, %119 : vector<2x256xf32>
    %122 = arith.addf %106, %121 : vector<2x256xf32>
    %c17_i32 = arith.constant 17 : i32
    %123 = tpu.dynamic_rotate %54 by %c17_i32 dim 1 : vector<2x256xf32>, i32 -> vector<2x256xf32>
    %c32 = arith.constant 32 : index
    %c0_43 = arith.constant 0 : index
    %124 = vector.load %arg6[%c32, %c0_43] : memref<98x256xf32, #tpu.memory_space<vmem>>, vector<2x256xf32>
    %125 = arith.mulf %124, %123 : vector<2x256xf32>
    %126 = arith.addf %110, %125 : vector<2x256xf32>
    %c16_i32 = arith.constant 16 : i32
    %127 = tpu.dynamic_rotate %54 by %c16_i32 dim 1 : vector<2x256xf32>, i32 -> vector<2x256xf32>
    %c34 = arith.constant 34 : index
    %c0_44 = arith.constant 0 : index
    %128 = vector.load %arg6[%c34, %c0_44] : memref<98x256xf32, #tpu.memory_space<vmem>>, vector<2x256xf32>
    %129 = arith.mulf %128, %127 : vector<2x256xf32>
    %130 = arith.addf %114, %129 : vector<2x256xf32>
    %c15_i32 = arith.constant 15 : i32
    %131 = tpu.dynamic_rotate %54 by %c15_i32 dim 1 : vector<2x256xf32>, i32 -> vector<2x256xf32>
    %c36 = arith.constant 36 : index
    %c0_45 = arith.constant 0 : index
    %132 = vector.load %arg6[%c36, %c0_45] : memref<98x256xf32, #tpu.memory_space<vmem>>, vector<2x256xf32>
    %133 = arith.mulf %132, %131 : vector<2x256xf32>
    %134 = arith.addf %118, %133 : vector<2x256xf32>
    %c14_i32 = arith.constant 14 : i32
    %135 = tpu.dynamic_rotate %54 by %c14_i32 dim 1 : vector<2x256xf32>, i32 -> vector<2x256xf32>
    %c38 = arith.constant 38 : index
    %c0_46 = arith.constant 0 : index
    %136 = vector.load %arg6[%c38, %c0_46] : memref<98x256xf32, #tpu.memory_space<vmem>>, vector<2x256xf32>
    %137 = arith.mulf %136, %135 : vector<2x256xf32>
    %138 = arith.addf %122, %137 : vector<2x256xf32>
    %c13_i32 = arith.constant 13 : i32
    %139 = tpu.dynamic_rotate %54 by %c13_i32 dim 1 : vector<2x256xf32>, i32 -> vector<2x256xf32>
    %c40 = arith.constant 40 : index
    %c0_47 = arith.constant 0 : index
    %140 = vector.load %arg6[%c40, %c0_47] : memref<98x256xf32, #tpu.memory_space<vmem>>, vector<2x256xf32>
    %141 = arith.mulf %140, %139 : vector<2x256xf32>
    %142 = arith.addf %126, %141 : vector<2x256xf32>
    %c3_i32 = arith.constant 3 : i32
    %143 = tpu.dynamic_rotate %54 by %c3_i32 dim 1 : vector<2x256xf32>, i32 -> vector<2x256xf32>
    %c42 = arith.constant 42 : index
    %c0_48 = arith.constant 0 : index
    %144 = vector.load %arg6[%c42, %c0_48] : memref<98x256xf32, #tpu.memory_space<vmem>>, vector<2x256xf32>
    %145 = arith.mulf %144, %143 : vector<2x256xf32>
    %146 = arith.addf %130, %145 : vector<2x256xf32>
    %c2_i32 = arith.constant 2 : i32
    %147 = tpu.dynamic_rotate %54 by %c2_i32 dim 1 : vector<2x256xf32>, i32 -> vector<2x256xf32>
    %c44 = arith.constant 44 : index
    %c0_49 = arith.constant 0 : index
    %148 = vector.load %arg6[%c44, %c0_49] : memref<98x256xf32, #tpu.memory_space<vmem>>, vector<2x256xf32>
    %149 = arith.mulf %148, %147 : vector<2x256xf32>
    %150 = arith.addf %134, %149 : vector<2x256xf32>
    %c1_i32 = arith.constant 1 : i32
    %151 = tpu.dynamic_rotate %54 by %c1_i32 dim 1 : vector<2x256xf32>, i32 -> vector<2x256xf32>
    %c46 = arith.constant 46 : index
    %c0_50 = arith.constant 0 : index
    %152 = vector.load %arg6[%c46, %c0_50] : memref<98x256xf32, #tpu.memory_space<vmem>>, vector<2x256xf32>
    %153 = arith.mulf %152, %151 : vector<2x256xf32>
    %154 = arith.addf %138, %153 : vector<2x256xf32>
    %c48 = arith.constant 48 : index
    %c0_51 = arith.constant 0 : index
    %155 = vector.load %arg6[%c48, %c0_51] : memref<98x256xf32, #tpu.memory_space<vmem>>, vector<2x256xf32>
    %156 = arith.mulf %155, %54 : vector<2x256xf32>
    %157 = arith.addf %142, %156 : vector<2x256xf32>
    %c255_i32 = arith.constant 255 : i32
    %158 = tpu.dynamic_rotate %54 by %c255_i32 dim 1 : vector<2x256xf32>, i32 -> vector<2x256xf32>
    %c50 = arith.constant 50 : index
    %c0_52 = arith.constant 0 : index
    %159 = vector.load %arg6[%c50, %c0_52] : memref<98x256xf32, #tpu.memory_space<vmem>>, vector<2x256xf32>
    %160 = arith.mulf %159, %158 : vector<2x256xf32>
    %161 = arith.addf %146, %160 : vector<2x256xf32>
    %c254_i32 = arith.constant 254 : i32
    %162 = tpu.dynamic_rotate %54 by %c254_i32 dim 1 : vector<2x256xf32>, i32 -> vector<2x256xf32>
    %c52 = arith.constant 52 : index
    %c0_53 = arith.constant 0 : index
    %163 = vector.load %arg6[%c52, %c0_53] : memref<98x256xf32, #tpu.memory_space<vmem>>, vector<2x256xf32>
    %164 = arith.mulf %163, %162 : vector<2x256xf32>
    %165 = arith.addf %150, %164 : vector<2x256xf32>
    %c253_i32 = arith.constant 253 : i32
    %166 = tpu.dynamic_rotate %54 by %c253_i32 dim 1 : vector<2x256xf32>, i32 -> vector<2x256xf32>
    %c54 = arith.constant 54 : index
    %c0_54 = arith.constant 0 : index
    %167 = vector.load %arg6[%c54, %c0_54] : memref<98x256xf32, #tpu.memory_space<vmem>>, vector<2x256xf32>
    %168 = arith.mulf %167, %166 : vector<2x256xf32>
    %169 = arith.addf %154, %168 : vector<2x256xf32>
    %c243_i32 = arith.constant 243 : i32
    %170 = tpu.dynamic_rotate %54 by %c243_i32 dim 1 : vector<2x256xf32>, i32 -> vector<2x256xf32>
    %c56 = arith.constant 56 : index
    %c0_55 = arith.constant 0 : index
    %171 = vector.load %arg6[%c56, %c0_55] : memref<98x256xf32, #tpu.memory_space<vmem>>, vector<2x256xf32>
    %172 = arith.mulf %171, %170 : vector<2x256xf32>
    %173 = arith.addf %157, %172 : vector<2x256xf32>
    %c242_i32 = arith.constant 242 : i32
    %174 = tpu.dynamic_rotate %54 by %c242_i32 dim 1 : vector<2x256xf32>, i32 -> vector<2x256xf32>
    %c58 = arith.constant 58 : index
    %c0_56 = arith.constant 0 : index
    %175 = vector.load %arg6[%c58, %c0_56] : memref<98x256xf32, #tpu.memory_space<vmem>>, vector<2x256xf32>
    %176 = arith.mulf %175, %174 : vector<2x256xf32>
    %177 = arith.addf %161, %176 : vector<2x256xf32>
    %c241_i32 = arith.constant 241 : i32
    %178 = tpu.dynamic_rotate %54 by %c241_i32 dim 1 : vector<2x256xf32>, i32 -> vector<2x256xf32>
    %c60 = arith.constant 60 : index
    %c0_57 = arith.constant 0 : index
    %179 = vector.load %arg6[%c60, %c0_57] : memref<98x256xf32, #tpu.memory_space<vmem>>, vector<2x256xf32>
    %180 = arith.mulf %179, %178 : vector<2x256xf32>
    %181 = arith.addf %165, %180 : vector<2x256xf32>
    %c240_i32 = arith.constant 240 : i32
    %182 = tpu.dynamic_rotate %54 by %c240_i32 dim 1 : vector<2x256xf32>, i32 -> vector<2x256xf32>
    %c62 = arith.constant 62 : index
    %c0_58 = arith.constant 0 : index
    %183 = vector.load %arg6[%c62, %c0_58] : memref<98x256xf32, #tpu.memory_space<vmem>>, vector<2x256xf32>
    %184 = arith.mulf %183, %182 : vector<2x256xf32>
    %185 = arith.addf %169, %184 : vector<2x256xf32>
    %c239_i32 = arith.constant 239 : i32
    %186 = tpu.dynamic_rotate %54 by %c239_i32 dim 1 : vector<2x256xf32>, i32 -> vector<2x256xf32>
    %c64 = arith.constant 64 : index
    %c0_59 = arith.constant 0 : index
    %187 = vector.load %arg6[%c64, %c0_59] : memref<98x256xf32, #tpu.memory_space<vmem>>, vector<2x256xf32>
    %188 = arith.mulf %187, %186 : vector<2x256xf32>
    %189 = arith.addf %173, %188 : vector<2x256xf32>
    %c238_i32 = arith.constant 238 : i32
    %190 = tpu.dynamic_rotate %54 by %c238_i32 dim 1 : vector<2x256xf32>, i32 -> vector<2x256xf32>
    %c66 = arith.constant 66 : index
    %c0_60 = arith.constant 0 : index
    %191 = vector.load %arg6[%c66, %c0_60] : memref<98x256xf32, #tpu.memory_space<vmem>>, vector<2x256xf32>
    %192 = arith.mulf %191, %190 : vector<2x256xf32>
    %193 = arith.addf %177, %192 : vector<2x256xf32>
    %c237_i32 = arith.constant 237 : i32
    %194 = tpu.dynamic_rotate %54 by %c237_i32 dim 1 : vector<2x256xf32>, i32 -> vector<2x256xf32>
    %c68 = arith.constant 68 : index
    %c0_61 = arith.constant 0 : index
    %195 = vector.load %arg6[%c68, %c0_61] : memref<98x256xf32, #tpu.memory_space<vmem>>, vector<2x256xf32>
    %196 = arith.mulf %195, %194 : vector<2x256xf32>
    %197 = arith.addf %181, %196 : vector<2x256xf32>
    %c227_i32 = arith.constant 227 : i32
    %198 = tpu.dynamic_rotate %54 by %c227_i32 dim 1 : vector<2x256xf32>, i32 -> vector<2x256xf32>
    %c70 = arith.constant 70 : index
    %c0_62 = arith.constant 0 : index
    %199 = vector.load %arg6[%c70, %c0_62] : memref<98x256xf32, #tpu.memory_space<vmem>>, vector<2x256xf32>
    %200 = arith.mulf %199, %198 : vector<2x256xf32>
    %201 = arith.addf %185, %200 : vector<2x256xf32>
    %c226_i32 = arith.constant 226 : i32
    %202 = tpu.dynamic_rotate %54 by %c226_i32 dim 1 : vector<2x256xf32>, i32 -> vector<2x256xf32>
    %c72 = arith.constant 72 : index
    %c0_63 = arith.constant 0 : index
    %203 = vector.load %arg6[%c72, %c0_63] : memref<98x256xf32, #tpu.memory_space<vmem>>, vector<2x256xf32>
    %204 = arith.mulf %203, %202 : vector<2x256xf32>
    %205 = arith.addf %189, %204 : vector<2x256xf32>
    %c225_i32 = arith.constant 225 : i32
    %206 = tpu.dynamic_rotate %54 by %c225_i32 dim 1 : vector<2x256xf32>, i32 -> vector<2x256xf32>
    %c74 = arith.constant 74 : index
    %c0_64 = arith.constant 0 : index
    %207 = vector.load %arg6[%c74, %c0_64] : memref<98x256xf32, #tpu.memory_space<vmem>>, vector<2x256xf32>
    %208 = arith.mulf %207, %206 : vector<2x256xf32>
    %209 = arith.addf %193, %208 : vector<2x256xf32>
    %c224_i32 = arith.constant 224 : i32
    %210 = tpu.dynamic_rotate %54 by %c224_i32 dim 1 : vector<2x256xf32>, i32 -> vector<2x256xf32>
    %c76 = arith.constant 76 : index
    %c0_65 = arith.constant 0 : index
    %211 = vector.load %arg6[%c76, %c0_65] : memref<98x256xf32, #tpu.memory_space<vmem>>, vector<2x256xf32>
    %212 = arith.mulf %211, %210 : vector<2x256xf32>
    %213 = arith.addf %197, %212 : vector<2x256xf32>
    %c223_i32 = arith.constant 223 : i32
    %214 = tpu.dynamic_rotate %54 by %c223_i32 dim 1 : vector<2x256xf32>, i32 -> vector<2x256xf32>
    %c78 = arith.constant 78 : index
    %c0_66 = arith.constant 0 : index
    %215 = vector.load %arg6[%c78, %c0_66] : memref<98x256xf32, #tpu.memory_space<vmem>>, vector<2x256xf32>
    %216 = arith.mulf %215, %214 : vector<2x256xf32>
    %217 = arith.addf %201, %216 : vector<2x256xf32>
    %c222_i32 = arith.constant 222 : i32
    %218 = tpu.dynamic_rotate %54 by %c222_i32 dim 1 : vector<2x256xf32>, i32 -> vector<2x256xf32>
    %c80 = arith.constant 80 : index
    %c0_67 = arith.constant 0 : index
    %219 = vector.load %arg6[%c80, %c0_67] : memref<98x256xf32, #tpu.memory_space<vmem>>, vector<2x256xf32>
    %220 = arith.mulf %219, %218 : vector<2x256xf32>
    %221 = arith.addf %205, %220 : vector<2x256xf32>
    %c221_i32 = arith.constant 221 : i32
    %222 = tpu.dynamic_rotate %54 by %c221_i32 dim 1 : vector<2x256xf32>, i32 -> vector<2x256xf32>
    %c82 = arith.constant 82 : index
    %c0_68 = arith.constant 0 : index
    %223 = vector.load %arg6[%c82, %c0_68] : memref<98x256xf32, #tpu.memory_space<vmem>>, vector<2x256xf32>
    %224 = arith.mulf %223, %222 : vector<2x256xf32>
    %225 = arith.addf %209, %224 : vector<2x256xf32>
    %c211_i32 = arith.constant 211 : i32
    %226 = tpu.dynamic_rotate %54 by %c211_i32 dim 1 : vector<2x256xf32>, i32 -> vector<2x256xf32>
    %c84 = arith.constant 84 : index
    %c0_69 = arith.constant 0 : index
    %227 = vector.load %arg6[%c84, %c0_69] : memref<98x256xf32, #tpu.memory_space<vmem>>, vector<2x256xf32>
    %228 = arith.mulf %227, %226 : vector<2x256xf32>
    %229 = arith.addf %213, %228 : vector<2x256xf32>
    %c210_i32 = arith.constant 210 : i32
    %230 = tpu.dynamic_rotate %54 by %c210_i32 dim 1 : vector<2x256xf32>, i32 -> vector<2x256xf32>
    %c86 = arith.constant 86 : index
    %c0_70 = arith.constant 0 : index
    %231 = vector.load %arg6[%c86, %c0_70] : memref<98x256xf32, #tpu.memory_space<vmem>>, vector<2x256xf32>
    %232 = arith.mulf %231, %230 : vector<2x256xf32>
    %233 = arith.addf %217, %232 : vector<2x256xf32>
    %c209_i32 = arith.constant 209 : i32
    %234 = tpu.dynamic_rotate %54 by %c209_i32 dim 1 : vector<2x256xf32>, i32 -> vector<2x256xf32>
    %c88 = arith.constant 88 : index
    %c0_71 = arith.constant 0 : index
    %235 = vector.load %arg6[%c88, %c0_71] : memref<98x256xf32, #tpu.memory_space<vmem>>, vector<2x256xf32>
    %236 = arith.mulf %235, %234 : vector<2x256xf32>
    %237 = arith.addf %221, %236 : vector<2x256xf32>
    %c208_i32 = arith.constant 208 : i32
    %238 = tpu.dynamic_rotate %54 by %c208_i32 dim 1 : vector<2x256xf32>, i32 -> vector<2x256xf32>
    %c90 = arith.constant 90 : index
    %c0_72 = arith.constant 0 : index
    %239 = vector.load %arg6[%c90, %c0_72] : memref<98x256xf32, #tpu.memory_space<vmem>>, vector<2x256xf32>
    %240 = arith.mulf %239, %238 : vector<2x256xf32>
    %241 = arith.addf %225, %240 : vector<2x256xf32>
    %c207_i32 = arith.constant 207 : i32
    %242 = tpu.dynamic_rotate %54 by %c207_i32 dim 1 : vector<2x256xf32>, i32 -> vector<2x256xf32>
    %c92 = arith.constant 92 : index
    %c0_73 = arith.constant 0 : index
    %243 = vector.load %arg6[%c92, %c0_73] : memref<98x256xf32, #tpu.memory_space<vmem>>, vector<2x256xf32>
    %244 = arith.mulf %243, %242 : vector<2x256xf32>
    %245 = arith.addf %229, %244 : vector<2x256xf32>
    %c206_i32 = arith.constant 206 : i32
    %246 = tpu.dynamic_rotate %54 by %c206_i32 dim 1 : vector<2x256xf32>, i32 -> vector<2x256xf32>
    %c94 = arith.constant 94 : index
    %c0_74 = arith.constant 0 : index
    %247 = vector.load %arg6[%c94, %c0_74] : memref<98x256xf32, #tpu.memory_space<vmem>>, vector<2x256xf32>
    %248 = arith.mulf %247, %246 : vector<2x256xf32>
    %249 = arith.addf %233, %248 : vector<2x256xf32>
    %c205_i32 = arith.constant 205 : i32
    %250 = tpu.dynamic_rotate %54 by %c205_i32 dim 1 : vector<2x256xf32>, i32 -> vector<2x256xf32>
    %c96 = arith.constant 96 : index
    %c0_75 = arith.constant 0 : index
    %251 = vector.load %arg6[%c96, %c0_75] : memref<98x256xf32, #tpu.memory_space<vmem>>, vector<2x256xf32>
    %252 = arith.mulf %251, %250 : vector<2x256xf32>
    %253 = arith.addf %237, %252 : vector<2x256xf32>
    %254 = arith.addf %253, %241 : vector<2x256xf32>
    %255 = arith.addf %245, %249 : vector<2x256xf32>
    %256 = arith.addf %254, %255 : vector<2x256xf32>
    %cst_76 = arith.constant dense<0.000000e+00> : vector<256xf32>
    %257 = vector.multi_reduction <add>, %256, %cst_76 [0] : vector<2x256xf32> to vector<256xf32>
    %258 = vector.shape_cast %257 : vector<256xf32> to vector<1x256xf32>
    %cst_77 = arith.constant 0.000000e+00 : f32
    %259 = vector.broadcast %cst_77 : f32 to vector<1x256xf32>
    %260 = arith.cmpf oge, %258, %259 : vector<1x256xf32>
    %cst_78 = arith.constant 1.000000e-01 : f32
    %261 = vector.broadcast %cst_78 : f32 to vector<1x256xf32>
    %262 = arith.mulf %261, %258 : vector<1x256xf32>
    %263 = arith.select %260, %258, %262 : vector<1x256xi1>, vector<1x256xf32>
    %264 = arith.negf %263 : vector<1x256xf32>
    %265 = math.exp %264 : vector<1x256xf32>
    %cst_79 = arith.constant 1.000000e+00 : f32
    %266 = vector.broadcast %cst_79 : f32 to vector<1x256xf32>
    %267 = arith.addf %266, %265 : vector<1x256xf32>
    %268 = arith.divf %266, %267 : vector<1x256xf32>
    %269 = vector.broadcast %268 : vector<1x256xf32> to vector<32x256xf32>
    %270 = arith.mulf %40, %269 : vector<32x256xf32>
    %c0_80 = arith.constant 0 : index
    %c0_81 = arith.constant 0 : index
    %c0_82 = arith.constant 0 : index
    %271 = vector.load %arg7[%c0_80, %c0_81, %c0_82] : memref<1x32x256xf32, #tpu.memory_space<vmem>>, vector<1x32x256xf32>
    %272 = vector.shape_cast %271 : vector<1x32x256xf32> to vector<32x256xf32>
    %273 = vector.shape_cast %270 : vector<32x256xf32> to vector<1x32x256xf32>
    tpu.vector_store %arg7[%c0_80, %c0_81, %c0_82], %273 {strides = array<i32>} : memref<1x32x256xf32, #tpu.memory_space<vmem>>, vector<1x32x256xf32>,
    return
  }
  func.func @transform_0(%arg0: i32) -> (i32, i32, i32) {
    %c0_i32 = arith.constant 0 : i32
    %c0_i32_0 = arith.constant 0 : i32
    %c0_i32_1 = arith.constant 0 : i32
    return %arg0, %c0_i32, %c0_i32_0 : i32, i32, i32
  }
  func.func @transform_1(%arg0: i32) -> (i32, i32) {
    %c0_i32 = arith.constant 0 : i32
    %c0_i32_0 = arith.constant 0 : i32
    %c0_i32_1 = arith.constant 0 : i32
    return %c0_i32, %c0_i32_0 : i32, i32
  }
  func.func @transform_2(%arg0: i32) -> (i32, i32) {
    %c0_i32 = arith.constant 0 : i32
    %c0_i32_0 = arith.constant 0 : i32
    %c0_i32_1 = arith.constant 0 : i32
    return %c0_i32, %c0_i32_0 : i32, i32
  }
  func.func @transform_3(%arg0: i32) -> (i32, i32) {
    %c0_i32 = arith.constant 0 : i32
    %c0_i32_0 = arith.constant 0 : i32
    %c0_i32_1 = arith.constant 0 : i32
    return %c0_i32, %c0_i32_0 : i32, i32
  }
  func.func @transform_4(%arg0: i32) -> (i32, i32) {
    %c0_i32 = arith.constant 0 : i32
    %c0_i32_0 = arith.constant 0 : i32
    %c0_i32_1 = arith.constant 0 : i32
    return %c0_i32, %c0_i32_0 : i32, i32
  }
  func.func @transform_5(%arg0: i32) -> (i32, i32) {
    %c0_i32 = arith.constant 0 : i32
    %c0_i32_0 = arith.constant 0 : i32
    %c0_i32_1 = arith.constant 0 : i32
    return %c0_i32, %c0_i32_0 : i32, i32
  }
  func.func @transform_6(%arg0: i32) -> (i32, i32, i32) {
    %c0_i32 = arith.constant 0 : i32
    %c0_i32_0 = arith.constant 0 : i32
    %c0_i32_1 = arith.constant 0 : i32
    return %arg0, %c0_i32, %c0_i32_0 : i32, i32, i32
  }
}

</mosaic_0001>

<bundles_post_ra>
// kernel: tpu_custom_call.1
= control target key start
LH: loop header
LB: loop body
LE: loop exit
PB: predicated region body
PF: predicated region fallthrough
CT: control target
= control target key end

     0   :  { %11 = vsyncpa [#allocation3], 0  ;;  %s2551_s0 = inlined_call_operand.hbm [shape: f32[2,32,256], index: 0, kind: input, shape index: {}]   ;;  %s2552_s1 = inlined_call_operand.vmem [shape: f32[32,2], index: 1, kind: input, shape index: {}]   ;;  %s2553_s2 = inlined_call_operand.vmem [shape: f32[1,2], index: 2, kind: input, shape index: {}]   ;;  %s2554_s3 = inlined_call_operand.vmem [shape: f32[32,2], index: 3, kind: input, shape index: {}]   ;;  %s2555_s4 = inlined_call_operand.vmem [shape: f32[32,1], index: 4, kind: input, shape index: {}]   ;;  %s2556_s5 = inlined_call_operand.hbm [shape: f32[98,256], index: 5, kind: input, shape index: {}]   ;;  %s2557_s6 = inlined_call_operand.hbm [shape: f32[2,32,256], index: 6, kind: output, shape index: {}]  }
   0x1   :  { %13 = vsyncpa [#allocation3 + $0x1], 0 }
   0x2   :  { %14 = vsyncpa [#allocation6], 0 }
   0x3   :  { %15 = vsyncpa [#allocation4], 0 }
   0x4   :  { %17 = vsyncpa [#allocation4 + $0x1], 0  ;;  %s1896_s21 = smov 0   ;;  %s1898_s22 = smov 0  }
   0x5   :  { %s1900_s23 = smov 0   ;;  %s1902_s24 = smov 0  }
   0x6 LB: > { %s1917_s25 = sadd.s32 4294967295, %s1804_s24   ;;  %s1517_s26 = sadd.s32 4294967294, %s1804_s24   ;;  %s1804_s24 = sphi %s1902_s24, %s2577_s24   ;;  %s1800_s23 = sphi %s1900_s23, %s2576_s23   ;;  %s1796_s22 = sphi %s1898_s22, %s2575_s22   ;;  %s1792_s21 = sphi %s1896_s21, %s2574_s21  }
   0x7   : > { %p43_p0 = scmp.ne.s32.totalorder %s1796_s22, %s1792_s21  ;;  %p2558_p1 = scmp.eq.s32.totalorder %s1917_s25, 0 }
   0x8   : > { %p178_p3 = scmp.eq.s32.totalorder %s1517_s26, 1  ;;  %p1518_p5 = scmp.ge.s32.totalorder %s1804_s24, 1 }
   0x9   : > { %p1926_p4 = por %p2558_p1, %p43_p0  ;;  %p185_p7 = scmp.lt.s32.totalorder %s1804_s24, 3 }
   0xa   : > { %p1931_p6 = por %p178_p3, %p43_p0  ;;  %s1806_s30 = smov [#allocation5]  }
   0xb   : > { %s2561_s27 = scalar_select %p1926_p4, 1, 0 }
   0xc   : > { %s2562_s28 = scalar_select %p1931_p6, 1, 0 }
   0xd   : > { %p1936_p8 = pnand %p1518_p5, %p185_p7  ;;  %s209_s7 = sshll.u32 %s1806_s30, 4  ;;  %s1940_s7 = int_to_ptr.vmem [resolvable:$true] %s209_s7 }
   0xe   : > { %s1952_s9 = sadd.s32 1, %s1804_s24   ;;  %s30_s10 = sadd.s32 1, %s1800_s23 }
   0xf   : > { %s2563_s29 = scalar_select %p1936_p8, 1, 0 }
  0x10   : > { %p1549_p9 = pneg %p1936_p8  ;;  %s27_s11 = ssub.s32 %s1804_s24, %s1952_s9 }
  0x11   : > { %s1676_s14 = scalar_lea.hbm %s2556_s5, 3328 }
  0x12   : > { %p1947_p11 = pnand %p1549_p9, %p2558_p1  ;;  %p1677_p12 = scmp.ne.s32.totalorder %s2556_s5, %s1676_s14 }
  0x13   : > { %p1683_p5 = scmp.lt.u32.totalorder %s1676_s14, %s2556_s5 }
  0x14   : > { %p1678_p13 = pneg %p1947_p11 }
  0x16   : > { %p1679_p0 = pnand %p1678_p13, %p1677_p12 }
  0x18   : > { %p1680_p3 = pneg %p1679_p0 }
  0x1a   : > { %p1685_p7 = pnand %p1683_p5, %p1680_p3 }
  0x1c   : > { %1688 = shalt.err (!%p1685_p7)
}
  0x1d   : > { %s1689_s19 = scalar_lea.vmem %s1940_s7, 3328  ;;  %p1697_p2 = scmp.lt.s32.totalorder %s1940_s7, %s1940_s7 }
  0x1e   : > { %p1690_p9 = scmp.ne.s32.totalorder %s1940_s7, %s1689_s19  ;;  %p1698_p6 = scmp.lt.s32.totalorder %s1689_s19, %s1689_s19 }
  0x20   : > { %p1692_p10 = pnand %p1690_p9, %p1678_p13  ;;  %p1699_p4 = por %p1698_p6, %p1697_p2 }
  0x22   : > { %p1693_p1 = pneg %p1692_p10 }
  0x24   : > { %p1700_p8 = pnand %p1699_p4, %p1693_p1 }
  0x26   : > { %1703 = shalt.err (!%p1700_p8)
}
  0x27   : > { %s1807_s20 = smov 256   ;;  %s1808_s26 = smov 16  }
  0x28   : > { %1552 = dma.hbm_to_vmem [thread:$0]  (!%p1947_p11), %s2556_s5, 3328, %s1940_s7, [#allocation6], %s1807_s20, %s1807_s20, %s1808_s26  }
  0x29   : > { %p28_p1 = scmp.eq.s32.totalorder %s27_s11, 0  ;;  %p37_p2 = scmp.ne.s32.totalorder %s1800_s23, %s1796_s22 }
  0x2a   : > { %p38_p4 = scmp.eq.s32.totalorder %s1804_s24, 0  ;;  %p1562_p6 = scmp.lt.s32.totalorder %s1804_s24, 2 }
  0x2b   : > { %s1986_s13 = scalar_select %p28_p1, %s1800_s23, %s30_s10  }
  0x2c   : > { %p39_p8 = por %p38_p4, %p37_p2  ;;  %p2565_p10 = scmp.eq.s32.totalorder %s1917_s25, 1 }
  0x2d   : > { %s223_s8 = sand.u32 1, %s1800_s23   ;;  %s1539_s15 = sshll.u32 %s1804_s24, 10 }
  0x2e   : > { %p1990_p12 = por %p2565_p10, %p37_p2  ;;  %s1521_s16 = sshll.u32 %s223_s8, 6 }
  0x2f   : > { %s1999_s19 = scalar_lea.hbm %s2551_s0, %s1539_s15  ;;  %s227_s7 = scalar_lea.vmem [#allocation2], %s1521_s16 }
  0x30   : > { %s234_s10 = sshll.u32 %s227_s7, 4  ;;  %p2001_p11 = pnand %p1562_p6, %p39_p8  ;;  %s2005_s10 = int_to_ptr.vmem [resolvable:$true] %s234_s10 }
  0x31   : > { %s2007_s30 = scalar_lea.sflag [#allocation3], %s223_s8  ;;  %s1704_s12 = scalar_lea.hbm %s1999_s19, 1024 }
  0x32   : > { %p1705_p13 = scmp.ne.s32.totalorder %s1999_s19, %s1704_s12  ;;  %p1706_p0 = pneg %p2001_p11 }
  0x33   : > { %s1709_s17 = scalar_lea.hbm %s2551_s0, 2048  ;;  %p1710_p7 = scmp.lt.u32.totalorder %s1999_s19, %s2551_s0 }
  0x34   : > { %p1707_p3 = pnand %p1706_p0, %p1705_p13  ;;  %p1711_p9 = scmp.lt.u32.totalorder %s1709_s17, %s1704_s12 }
  0x35   : > { %p1713_p2 = scmp.lt.u32.totalorder %s1704_s12, %s1999_s19 }
  0x36   : > { %p1708_p5 = pneg %p1707_p3  ;;  %p1712_p1 = por %p1711_p9, %p1710_p7 }
  0x38   : > { %p1714_p4 = por %p1713_p2, %p1712_p1 }
  0x3a   : > { %p1715_p6 = pnand %p1714_p4, %p1708_p5 }
  0x3c   : > { %1718 = shalt.err (!%p1715_p6)
}
  0x3d   : > { %s1719_s8 = scalar_lea.vmem %s2005_s10, 1024  ;;  %s1809_s15 = smov [#allocation2]  }
  0x3e   : > { %p1720_p8 = scmp.ne.s32.totalorder %s2005_s10, %s1719_s8  ;;  %s1724_s16 = sshll.u32 %s1809_s15, 4  ;;  %s1725_s16 = int_to_ptr.vmem [resolvable:$false] %s1724_s16 }
  0x3f   : > { %s1726_s18 = scalar_lea.vmem %s1725_s16, 2048  ;;  %p1727_p3 = scmp.lt.s32.totalorder %s2005_s10, %s1725_s16 }
  0x40   : > { %p1722_p10 = pnand %p1720_p8, %p1706_p0  ;;  %p1728_p7 = scmp.lt.s32.totalorder %s1726_s18, %s1719_s8 }
  0x42   : > { %p1723_p13 = pneg %p1722_p10  ;;  %p1729_p9 = por %p1728_p7, %p1727_p3 }
  0x44   : > { %p1730_p1 = pnand %p1729_p9, %p1723_p13 }
  0x46   : > { %1733 = shalt.err (!%p1730_p1)
}
  0x47   : > { %1556 = dma.hbm_to_vmem [thread:$0]  (!%p2001_p11), %s1999_s19, 1024, %s2005_s10, %s2007_s30, %s1807_s20, %s1807_s20, %s1808_s26  }
  0x48   : > { %p2568_p0 = scmp.ne.s32.totalorder %s2563_s29, 0 }
  0x49   : > { %s2041_s12 = sand.u32 (!%p2568_p0), 1, %s1796_s22   ;;  %p2569_p5 = scmp.ne.s32.totalorder (!%p2568_p0), %s2561_s27, 0 }
  0x4a   : > { %246 = sbr.rel (%p2568_p0) target bundleno = 982 (0x3d6), region = 44  ;;  %s1525_s17 = sshll.u32 (!%p2568_p0), %s2041_s12, 6 }
  0x4b   : > { %s249_s7 = scalar_lea.sflag (!%p2568_p0), [#allocation3], %s2041_s12  ;;  %s252_s11 = scalar_lea.vmem (!%p2568_p0), [#allocation2], %s1525_s17 }
  0x51   : > { %1779 = dma.done.wait (%p2569_p5), %s249_s7, 1024  }
  0x52   : > { %1781 = vsyncadd (%p2569_p5), %s249_s7, 4294966272  ;;  %p2570_p11 = scmp.eq.s32.totalorder %s1917_s25, 0 }
  0x54   : > { %1783 = dma.done.wait (%p2570_p11), [#allocation6], 3328   ;;  %p2571_p2 = pmov %p2570_p11 }
  0x55   : > { %v2055_v0 = vld [vmem:[%s252_s11 + $0x20] sm:$0xff]  ;;  %v2057_v1 = vld [vmem:[%s252_s11 + $0x28] sm:$0xff]  ;;  %v2065_v5 = vld [vmem:[%s252_s11 + $0x10] sm:$0xff]  ;;  %vm339_vm0 = vcmask 15360   ;;  %s1811_s27 = smov 49   ;;  %s1812_s29 = smov 51  }
  0x56   : > { %1785 = vsyncadd (%p2571_p2), [#allocation6], 4294963968  ;;  %v2059_v2 = vld [vmem:[%s252_s11] sm:$0xff]  ;;  %v299_v3 = vadd.f32 %v2057_v1, %v2055_v0  ;;  %v2063_v4 = vld [vmem:[%s252_s11 + $0x8] sm:$0xff]  ;;  %v316_v15 = vmax.f32 %v2055_v0, %v2057_v1  ;;  %s1813_s20 = smov 48   ;;  %s1814_s26 = smov 47  }
  0x57   : > { %v2067_v6 = vld [vmem:[%s252_s11 + $0x18] sm:$0xff]  ;;  %v293_v7 = vadd.f32 %v2063_v4, %v2059_v2  ;;  %v310_v8 = vmax.f32 %v2059_v2, %v2063_v4  ;;  %v2075_v10 = vld [vmem:[%s252_s11 + $0x30] sm:$0xff]  ;;  %v322_v19 = vld [vmem:[%s2552_s1] sm:$0xff]  ;;  %s1815_s19 = smov 50   ;;  %s1816_s10 = smov 46  }
  0x58   : > { %300 = vadd.xlane.f32.xlu1 %v299_v3  ;;  %v296_v9 = vadd.f32 %v2067_v6, %v2065_v5  ;;  %v2077_v11 = vld [vmem:[%s252_s11 + $0x38] sm:$0xff]  ;;  %v313_v13 = vmax.f32 %v2065_v5, %v2067_v6  ;;  %v323_v23 = vld [vmem:[%s2552_s1 + $0x8] sm:$0xff]  ;;  %v324_v24 = vld [vmem:[%s2552_s1 + $0x10] sm:$0xff]  ;;  %v375_v3 = vlaneseq  ;;  %s1817_s30 = smov 45   ;;  %s1818_s8 = smov 35  }
  0x59   : > { %294 = vadd.xlane.f32.xlu0 %v293_v7  ;;  %v302_v12 = vadd.f32 %v2077_v11, %v2075_v10  ;;  %v319_v14 = vmax.f32 %v2075_v10, %v2077_v11  ;;  %v325_v30 = vld [vmem:[%s2552_s1 + $0x18] sm:$0xff]  ;;  %v326_v7 = vld [vmem:[%s2553_s2] sm:$0x1]  ;;  %s1819_s15 = smov 34   ;;  %s1820_s16 = smov 33  }
  0x5a   : > { %s1821_s18 = smov 32   ;;  %s1822_s7 = smov 31  }
  0x5b   : > { %s1823_s11 = smov 30  }
  0x5c   : > { %311 = vmax.xlane.f32.xlu1 %v310_v8 }
  0x5d   : > { %297 = vadd.xlane.f32.xlu0 %v296_v9 }
  0x60   : > { %303 = vadd.xlane.f32.xlu1 %v302_v12 }
  0x61   : > { %314 = vmax.xlane.f32.xlu0 %v313_v13  ;;  %v2111_v13 = vshrl.u32 %v375_v3, 7 }
  0x63   : > { %vm496_vm1 = vcmp.eq.s32.totalorder %v2111_v13, 0 }
  0x64   : > { %320 = vmax.xlane.f32.xlu1 %v319_v14 }
  0x65   : > { %317 = vmax.xlane.f32.xlu0 %v316_v15 }
  0xe5   : > { %v301_v16 = vpop.xlane.xlu1 %300 }
  0xe6   : > { %v295_v17 = vpop.xlane.xlu0 %294  ;;  %v308_v20 = vmul.f32 0.00390625, %v301_v16 }
  0xe7   : > { %v306_v18 = vmul.f32 0.00390625, %v295_v17  ;;  %v377_v17 = vsub.s32 0, %v2111_v13  ;;  %v2246_v13 = vand.u32 127, %v375_v3 }
  0xe8   : > { %v337_v29 = vmul.f32 %v324_v24, %v308_v20  ;;  %v327_v20 = vld [vmem:[%s2554_s3] sm:$0xff] }
  0xe9   : > { %v312_v21 = vpop.xlane.xlu1 %311  ;;  %v335_v25 = vmul.f32 %v322_v19, %v306_v18  ;;  %vm505_vm2 = vcmp.lt.s32.totalorder %v2246_v13, 51  ;;  %vm518_vm3 = vcmp.lt.s32.totalorder %v2246_v13, 50  ;;  %vm537_vm4 = vcmp.lt.s32.totalorder %v2246_v13, 49 }
  0xea   : > { %v298_v22 = vpop.xlane.xlu0 %297  ;;  %v355_v34 = vmul.f32 %v322_v19, %v312_v21  ;;  %v343_v40 = vsel %vm339_vm0, %v337_v29, 0.0  ;;  %v328_v19 = vld [vmem:[%s2554_s3 + $0x8] sm:$0xff]  ;;  %vm556_vm5 = vcmp.lt.s32.totalorder %v2246_v13, 48  ;;  %vm575_vm6 = vcmp.lt.s32.totalorder %v2246_v13, 47 }
  0xeb   : > { %v307_v26 = vmul.f32 0.00390625, %v298_v22  ;;  %v340_v33 = vsel %vm339_vm0, %v335_v25, 0.0  ;;  %v330_v22 = vld [vmem:[%s2554_s3 + $0x18] sm:$0xff]  ;;  %vm588_vm7 = vcmp.lt.s32.totalorder %v2246_v13, 46  ;;  %vm607_vm8 = vcmp.lt.s32.totalorder %v2246_v13, 45 }
  0xec   : > { %v359_v46 = vsel %vm339_vm0, %v355_v34, 0.0  ;;  %v331_v34 = vld [vmem:[%s2555_s4] sm:$0xff]  ;;  %vm626_vm9 = vcmp.lt.s32.totalorder %v2246_v13, 35  ;;  %vm645_vm10 = vcmp.lt.s32.totalorder %v2246_v13, 34  ;;  %vm658_vm11 = vcmp.lt.s32.totalorder %v2246_v13, 33 }
  0xed   : > { %v304_v27 = vpop.xlane.xlu1 %303  ;;  %v336_v28 = vmul.f32 %v323_v23, %v307_v26  ;;  %vm677_vm12 = vcmp.lt.s32.totalorder %v2246_v13, 32  ;;  %vm696_vm13 = vcmp.lt.s32.totalorder %v2246_v13, 31  ;;  %vm715_vm14 = vcmp.lt.s32.totalorder %v2246_v13, 30 }
  0xee   : > { %v309_v31 = vmul.f32 0.00390625, %v304_v27  ;;  %v315_v32 = vpop.xlane.xlu0 %314  ;;  %vm728_vm15 = vcmp.lt.s32.totalorder %v2246_v13, 29 }
  0xef   : > { %v341_v35 = vsel %vm339_vm0, %v336_v28, 0.0  ;;  %v356_v36 = vmul.f32 %v323_v23, %v315_v32  ;;  %v329_v23 = vld [vmem:[%s2554_s3 + $0x10] sm:$0xff]  ;;  %v1810_v32 = vmov 0  }
  0xf0   : > { %v342_v37 = vadd.f32 %v341_v35, %v340_v33  ;;  %v338_v38 = vmul.f32 %v325_v30, %v309_v31  ;;  %1651 = vset.pattern.permute.xlu1 %v1810_v32  ;;  %1650 = vset.pattern.permute.xlu0 %v1810_v32  ;;  %v332_v33 = vld [vmem:[%s2555_s4 + $0x8] sm:$0xff] }
  0xf1   : > { %v360_v39 = vsel %vm339_vm0, %v356_v36, 0.0  ;;  %v321_v41 = vpop.xlane.xlu1 %320  ;;  %v396_v35 = vmul.f32 2.0, %v332_v33  ;;  %v395_v36 = vmul.f32 2.0, %v331_v34 }
  0xf2   : > { %v344_v42 = vadd.f32 %v343_v40, %v342_v37  ;;  %v318_v43 = vpop.xlane.xlu0 %317  ;;  %v345_v44 = vsel %vm339_vm0, %v338_v38, 0.0  ;;  %v358_v45 = vmul.f32 %v325_v30, %v321_v41  ;;  %v361_v48 = vadd.f32 %v360_v39, %v359_v46  ;;  %v334_v37 = vld [vmem:[%s2555_s4 + $0x18] sm:$0xff]  ;;  %v333_v38 = vld [vmem:[%s2555_s4 + $0x10] sm:$0xff] }
  0xf3   : > { %v357_v47 = vmul.f32 %v324_v24, %v318_v43  ;;  %v398_v43 = vmul.f32 2.0, %v334_v37 }
  0xf4   : > { %v346_v49 = vadd.f32 %v345_v44, %v344_v42  ;;  %v364_v51 = vsel %vm339_vm0, %v358_v45, 0.0  ;;  %v397_v44 = vmul.f32 2.0, %v333_v38 }
  0xf5   : > { %v362_v50 = vsel %vm339_vm0, %v357_v47, 0.0 }
  0xf6   : > { %v363_v52 = vadd.f32 %v362_v50, %v361_v48  ;;  %v347_v53 = vrot.slane %v346_v49, 4 }
  0xf8   : > { %v348_v54 = vadd.f32 %v347_v53, %v346_v49  ;;  %v365_v55 = vadd.f32 %v364_v51, %v363_v52 }
  0xfa   : > { %v349_v56 = vrot.slane %v348_v54, 2  ;;  %v366_v57 = vrot.slane %v365_v55, 4 }
  0xfc   : > { %v350_v58 = vadd.f32 %v349_v56, %v348_v54  ;;  %v367_v59 = vadd.f32 %v366_v57, %v365_v55 }
  0xfe   : > { %v351_v60 = vrot.slane %v350_v58, 1  ;;  %v368_v61 = vrot.slane %v367_v59, 2 }
 0x100   : > { %v352_v62 = vadd.f32 %v351_v60, %v350_v58  ;;  %v369_v63 = vadd.f32 %v368_v61, %v367_v59 }
 0x102   : > { %v370_v8 = vrot.slane %v369_v63, 1  ;;  %v353_v9 = vadd.f32 %v352_v62, %v326_v7 }
 0x104   : > { %v371_v12 = vadd.f32 %v370_v8, %v369_v63  ;;  %v354_v16 = vmax.f32 %v353_v9, 0.0 }
 0x106   : > { %v372_v14 = vadd.f32 %v371_v12, %v326_v7 }
 0x108   : > { %v373_v15 = vmax.f32 %v372_v14, 0.0 }
 0x10a   : > { %v374_v18 = vadd.f32 %v373_v15, %v354_v16 }
 0x10c   : > { %v378_v21 = vrot.slane %v374_v18, %v377_v17 }
 0x10e   : > { %v380_v24 = vmul.f32 %v378_v21, %v328_v19  ;;  %v379_v25 = vmul.f32 %v378_v21, %v327_v20  ;;  %v382_v28 = vmul.f32 %v378_v21, %v330_v22  ;;  %v381_v29 = vmul.f32 %v378_v21, %v329_v23 }
 0x110   : > { %v386_v26 = vsel %vm339_vm0, %v380_v24, 0.0  ;;  %v383_v27 = vsel %vm339_vm0, %v379_v25, 0.0  ;;  %v392_v30 = vsel %vm339_vm0, %v382_v28, 0.0  ;;  %v389_v31 = vsel %vm339_vm0, %v381_v29, 0.0 }
 0x111   : > { %387 = vadd.xlane.f32.xlu1 %v386_v26  ;;  %384 = vadd.xlane.f32.xlu0 %v383_v27  ;;  %vm747_vm0 = vcmp.lt.s32.totalorder %v2246_v13, 19 }
 0x115   : > { %393 = vadd.xlane.f32.xlu1 %v392_v30  ;;  %390 = vadd.xlane.f32.xlu0 %v389_v31 }
 0x19e   : > { %v388_v39 = vpop.xlane.xlu1 %387  ;;  %v385_v40 = vpop.xlane.xlu0 %384 }
 0x19f   : > { %v400_v41 = vadd.f32 %v396_v35, %v388_v39  ;;  %v399_v42 = vadd.f32 %v395_v36, %v385_v40 }
 0x1a1   : > { %v1529_v45 = vmul.f32 -1.442695, %v400_v41  ;;  %v1528_v46 = vmul.f32 -1.442695, %v399_v42 }
 0x1a2   : > { %v394_v47 = vpop.xlane.xlu1 %393  ;;  %v391_v48 = vpop.xlane.xlu0 %390 }
 0x1a3   : > { %1652 = vpow2.f32 %v1529_v45  ;;  %v402_v49 = vadd.f32 %v398_v43, %v394_v47  ;;  %v401_v50 = vadd.f32 %v397_v44, %v391_v48 }
 0x1a4   : > { %1654 = vpow2.f32 %v1528_v46 }
 0x1a5   : > { %v1531_v51 = vmul.f32 -1.442695, %v402_v49  ;;  %v1530_v52 = vmul.f32 -1.442695, %v401_v50 }
 0x1a7   : > { %1656 = vpow2.f32 %v1531_v51 }
 0x1a8   : > { %1658 = vpow2.f32 %v1530_v52 }
 0x1ad   : > { %v1653_v53 = vpop.eup %1652 }
 0x1ae   : > { %v1655_v54 = vpop.eup %1654  ;;  %v416_v55 = vadd.f32 1.0, %v1653_v53 }
 0x1af   : > { %v415_v56 = vadd.f32 1.0, %v1655_v54 }
 0x1b0   : > { %1660 = vrcp.f32 %v416_v55 }
 0x1b1   : > { %v1657_v57 = vpop.eup %1656  ;;  %1662 = vrcp.f32 %v415_v56 }
 0x1b2   : > { %v1659_v58 = vpop.eup %1658  ;;  %v418_v60 = vadd.f32 1.0, %v1657_v57 }
 0x1b3   : > { %v417_v59 = vadd.f32 1.0, %v1659_v58 }
 0x1b5   : > { %1664 = vrcp.f32 %v417_v59 }
 0x1b6   : > { %1666 = vrcp.f32 %v418_v60 }
 0x1ba   : > { %v1661_v61 = vpop.eup %1660 }
 0x1bb   : > { %v1663_v62 = vpop.eup %1662  ;;  %434 = vperm.xlu1 %1651, %v1661_v61  }
 0x1bc   : > { %429 = vperm.xlu0 %1650, %v1663_v62  }
 0x1bf   : > { %v1665_v63 = vpop.eup %1664 }
 0x1c0   : > { %439 = vperm.xlu1 %1651, %v1665_v63   ;;  %v1667_v7 = vpop.eup %1666 }
 0x1c4   : > { %444 = vperm.xlu1 %1651, %v1667_v7  }
 0x23a   : > { %v435_v8 = vpop.permute.xlu1 %434 }
 0x23b   : > { %v430_v9 = vpop.permute.xlu0 %429  ;;  %v2143_v12 = vmul.f32 %v435_v8, %v2065_v5  ;;  %v2146_v14 = vmul.f32 %v435_v8, %v2067_v6 }
 0x23c   : > { %v2149_v15 = vmul.f32 %v430_v9, %v2059_v2  ;;  %v2152_v16 = vmul.f32 %v430_v9, %v2063_v4 }
 0x23e   : > { %v473_v5 = vadd.f32 %v2143_v12, %v2149_v15  ;;  %v482_v6 = vadd.f32 %v2146_v14, %v2152_v16 }
 0x23f   : > { %v440_v17 = vpop.permute.xlu1 %439 }
 0x240   : > { %v2155_v18 = vmul.f32 %v440_v17, %v2055_v0  ;;  %v2158_v19 = vmul.f32 %v440_v17, %v2057_v1 }
 0x242   : > { %v474_v2 = vadd.f32 %v473_v5, %v2155_v18  ;;  %v483_v21 = vadd.f32 %v482_v6, %v2158_v19  ;;  %v455_v1 = vmax.f32 %v2149_v15, %v2155_v18  ;;  %v464_v22 = vmax.f32 %v2152_v16, %v2158_v19 }
 0x243   : > { %v445_v20 = vpop.permute.xlu1 %444 }
 0x244   : > { %v2167_v4 = vmul.f32 %v445_v20, %v2075_v10  ;;  %v2170_v0 = vmul.f32 %v445_v20, %v2077_v11 }
 0x246   : > { %v456_v23 = vmax.f32 %v2143_v12, %v2167_v4  ;;  %v465_v24 = vmax.f32 %v2146_v14, %v2170_v0  ;;  %v475_v25 = vadd.f32 %v474_v2, %v2167_v4  ;;  %v484_v10 = vadd.f32 %v483_v21, %v2170_v0 }
 0x248   : > { %v457_v26 = vmax.f32 %v455_v1, %v456_v23  ;;  %v466_v27 = vmax.f32 %v464_v22, %v465_v24  ;;  %v476_v11 = vrot.slane %v475_v25, 4  ;;  %v485_v28 = vrot.slane %v484_v10, 4  ;;  %v508_v22 = vld [vmem:[#allocation5] sm:$0x3]  ;;  %v509_v23 = vld [vmem:[#allocation5 + $0x8] sm:$0x3] }
 0x249   : > { %v578_v24 = vld [vmem:[#allocation5 + $0x10] sm:$0x3] }
 0x24a   : > { %v458_v29 = vrot.slane %v457_v26, 4  ;;  %v467_v30 = vrot.slane %v466_v27, 4  ;;  %v477_v31 = vadd.f32 %v476_v11, %v475_v25  ;;  %v486_v32 = vadd.f32 %v485_v28, %v484_v10  ;;  %v579_v25 = vld [vmem:[#allocation5 + $0x18] sm:$0x3] }
 0x24c   : > { %v459_v33 = vmax.f32 %v457_v26, %v458_v29  ;;  %v468_v34 = vmax.f32 %v466_v27, %v467_v30  ;;  %v478_v35 = vrot.slane %v477_v31, 2  ;;  %v487_v36 = vrot.slane %v486_v32, 2 }
 0x24e   : > { %v460_v37 = vrot.slane %v459_v33, 2  ;;  %v469_v38 = vrot.slane %v468_v34, 2  ;;  %v479_v39 = vadd.f32 %v478_v35, %v477_v31  ;;  %v488_v40 = vadd.f32 %v487_v36, %v486_v32  ;;  %v521_v32 = vld [vmem:[#allocation5] sm:$0xc] }
 0x250   : > { %v461_v41 = vmax.f32 %v459_v33, %v460_v37  ;;  %v470_v42 = vmax.f32 %v468_v34, %v469_v38  ;;  %v480_v43 = vrot.slane %v479_v39, 1  ;;  %v489_v44 = vrot.slane %v488_v40, 1 }
 0x252   : > { %v462_v45 = vrot.slane %v461_v41, 1  ;;  %v471_v46 = vrot.slane %v470_v42, 1  ;;  %v481_v47 = vadd.f32 %v480_v43, %v479_v39  ;;  %v490_v48 = vadd.f32 %v489_v44, %v488_v40  ;;  %v522_v39 = vld [vmem:[#allocation5 + $0x8] sm:$0xc]  ;;  %v591_v40 = vld [vmem:[#allocation5 + $0x10] sm:$0xc] }
 0x254   : > { %v463_v49 = vmax.f32 %v461_v41, %v462_v45  ;;  %v472_v50 = vmax.f32 %v470_v42, %v471_v46  ;;  %v492_v51 = vmul.f32 0.03125, %v481_v47  ;;  %v493_v52 = vmul.f32 0.03125, %v490_v48  ;;  %v592_v41 = vld [vmem:[#allocation5 + $0x18] sm:$0xc] }
 0x256   : > { %v2183_v53 = vsel %vm496_vm1, %v463_v49, %v492_v51  ;;  %v2185_v54 = vsel %vm496_vm1, %v472_v50, %v493_v52  ;;  %v540_v50 = vld [vmem:[#allocation5] sm:$0x30]  ;;  %v541_v51 = vld [vmem:[#allocation5 + $0x8] sm:$0x30]  ;;  %vm766_vm1 = vcmp.lt.s32.totalorder %v2246_v13, 18 }
 0x257   : > { %535 = vrot.lane.b32.xlu0 %v2185_v54, %s1811_s27  ;;  %499 = vrot.lane.b32.xlu1 %v2183_v53, %s1812_s29 }
 0x25b   : > { %554 = vrot.lane.b32.xlu0 %v2185_v54, %s1813_s20  ;;  %501 = vrot.lane.b32.xlu1 %v2185_v54, %s1812_s29  ;;  %s1825_s29 = smov 18  }
 0x25f   : > { %573 = vrot.lane.b32.xlu0 %v2185_v54, %s1814_s26  ;;  %514 = vrot.lane.b32.xlu1 %v2183_v53, %s1815_s19 }
 0x263   : > { %586 = vrot.lane.b32.xlu0 %v2185_v54, %s1816_s10  ;;  %516 = vrot.lane.b32.xlu1 %v2185_v54, %s1815_s19  ;;  %s1828_s19 = smov 16  }
 0x267   : > { %605 = vrot.lane.b32.xlu0 %v2185_v54, %s1817_s30  ;;  %533 = vrot.lane.b32.xlu1 %v2183_v53, %s1811_s27  ;;  %s1824_s27 = smov 29  }
 0x26b   : > { %624 = vrot.lane.b32.xlu0 %v2185_v54, %s1818_s8  ;;  %552 = vrot.lane.b32.xlu1 %v2183_v53, %s1813_s20  ;;  %s1826_s20 = smov 19  }
 0x26f   : > { %643 = vrot.lane.b32.xlu0 %v2185_v54, %s1819_s15  ;;  %571 = vrot.lane.b32.xlu1 %v2183_v53, %s1814_s26  ;;  %s1827_s26 = smov 14  }
 0x273   : > { %656 = vrot.lane.b32.xlu0 %v2185_v54, %s1820_s16  ;;  %584 = vrot.lane.b32.xlu1 %v2183_v53, %s1816_s10  ;;  %s1829_s10 = smov 15  }
 0x277   : > { %675 = vrot.lane.b32.xlu0 %v2185_v54, %s1821_s18  ;;  %603 = vrot.lane.b32.xlu1 %v2183_v53, %s1817_s30  ;;  %s1830_s30 = smov 1  }
 0x27b   : > { %694 = vrot.lane.b32.xlu0 %v2185_v54, %s1822_s7  ;;  %622 = vrot.lane.b32.xlu1 %v2183_v53, %s1818_s8  ;;  %s1831_s8 = smov 17  }
 0x27f   : > { %713 = vrot.lane.b32.xlu0 %v2185_v54, %s1823_s11  ;;  %641 = vrot.lane.b32.xlu1 %v2183_v53, %s1819_s15  ;;  %s1832_s15 = smov 3  }
 0x283   : > { %726 = vrot.lane.b32.xlu0 %v2185_v54, %s1824_s27  ;;  %654 = vrot.lane.b32.xlu1 %v2183_v53, %s1820_s16  ;;  %s1833_s16 = smov 2  }
 0x287   : > { %762 = vrot.lane.b32.xlu0 %v2183_v53, %s1825_s29  ;;  %673 = vrot.lane.b32.xlu1 %v2183_v53, %s1821_s18  ;;  %s1834_s18 = smov 125  }
 0x28b   : > { %745 = vrot.lane.b32.xlu0 %v2185_v54, %s1826_s20  ;;  %692 = vrot.lane.b32.xlu1 %v2183_v53, %s1822_s7  ;;  %s1835_s7 = smov 13  }
 0x28f   : > { %834 = vrot.lane.b32.xlu0 %v2185_v54, %s1827_s26  ;;  %711 = vrot.lane.b32.xlu1 %v2183_v53, %s1823_s11  ;;  %s1836_s11 = smov 127  }
 0x293   : > { %796 = vrot.lane.b32.xlu0 %v2185_v54, %s1828_s19  ;;  %724 = vrot.lane.b32.xlu1 %v2183_v53, %s1824_s27  ;;  %s1837_s27 = smov 126  }
 0x297   : > { %815 = vrot.lane.b32.xlu0 %v2185_v54, %s1829_s10  ;;  %743 = vrot.lane.b32.xlu1 %v2183_v53, %s1826_s20  ;;  %s1839_s20 = smov 114  }
 0x29b   : > { %904 = vrot.lane.b32.xlu0 %v2185_v54, %s1830_s30  ;;  %764 = vrot.lane.b32.xlu1 %v2185_v54, %s1825_s29  ;;  %s1838_s29 = smov 112  }
 0x29f   : > { %783 = vrot.lane.b32.xlu0 %v2185_v54, %s1831_s8  ;;  %832 = vrot.lane.b32.xlu1 %v2183_v53, %s1827_s26  ;;  %s1840_s26 = smov 113  }
 0x2a3   : > { %866 = vrot.lane.b32.xlu0 %v2185_v54, %s1832_s15  ;;  %794 = vrot.lane.b32.xlu1 %v2183_v53, %s1828_s19 }
 0x2a7   : > { %885 = vrot.lane.b32.xlu0 %v2185_v54, %s1833_s16  ;;  %813 = vrot.lane.b32.xlu1 %v2183_v53, %s1829_s10  ;;  %s1841_s10 = smov 99  }
 0x2ab   : > { %967 = vrot.lane.b32.xlu0 %v2185_v54, %s1834_s18  ;;  %902 = vrot.lane.b32.xlu1 %v2183_v53, %s1830_s30  ;;  %s1842_s30 = smov 115  }
 0x2af   : > { %853 = vrot.lane.b32.xlu0 %v2185_v54, %s1835_s7  ;;  %781 = vrot.lane.b32.xlu1 %v2183_v53, %s1831_s8  ;;  %s1843_s8 = smov 110  }
 0x2b3   : > { %929 = vrot.lane.b32.xlu0 %v2185_v54, %s1836_s11  ;;  %864 = vrot.lane.b32.xlu1 %v2183_v53, %s1832_s15  ;;  %s1844_s15 = smov 109  }
 0x2b7   : > { %948 = vrot.lane.b32.xlu0 %v2185_v54, %s1837_s27  ;;  %883 = vrot.lane.b32.xlu1 %v2183_v53, %s1833_s16  ;;  %s1845_s16 = smov 95  }
 0x2bb   : > { %1037 = vrot.lane.b32.xlu0 %v2185_v54, %s1838_s29  ;;  %965 = vrot.lane.b32.xlu1 %v2183_v53, %s1834_s18  ;;  %s1846_s18 = smov 111  }
 0x2bf   : > { %999 = vrot.lane.b32.xlu0 %v2185_v54, %s1839_s20  ;;  %851 = vrot.lane.b32.xlu1 %v2183_v53, %s1835_s7  ;;  %s1847_s7 = smov 97  }
 0x2c3   : > { %1018 = vrot.lane.b32.xlu0 %v2185_v54, %s1840_s26  ;;  %927 = vrot.lane.b32.xlu1 %v2183_v53, %s1836_s11  ;;  %s1848_s11 = smov 96  }
 0x2c7   : > { %1107 = vrot.lane.b32.xlu0 %v2185_v54, %s1841_s10  ;;  %946 = vrot.lane.b32.xlu1 %v2183_v53, %s1837_s27  ;;  %s1849_s27 = smov 82  }
 0x2c9   : > { %v536_v55 = vpop.permute.xlu0 %535  ;;  %v500_v56 = vpop.permute.xlu1 %499 }
 0x2cb   : > { %986 = vrot.lane.b32.xlu0 %v2185_v54, %s1842_s30  ;;  %1035 = vrot.lane.b32.xlu1 %v2183_v53, %s1838_s29  ;;  %s1850_s29 = smov 98  }
 0x2cd   : > { %v555_v57 = vpop.permute.xlu0 %554  ;;  %v502_v58 = vpop.permute.xlu1 %501 }
 0x2ce   : > { %v506_v59 = vsel %vm505_vm2, %v500_v56, %v502_v58  ;;  %v507_v3 = vsel %vm505_vm2, %v502_v58, %v500_v56  ;;  %v610_v58 = vld [vmem:[#allocation5 + $0x10] sm:$0x30]  ;;  %vm836_vm2 = vcmp.lt.s32.totalorder %v2246_v13, 14 }
 0x2cf   : > { %1069 = vrot.lane.b32.xlu0 %v2185_v54, %s1843_s8  ;;  %997 = vrot.lane.b32.xlu1 %v2183_v53, %s1839_s20  ;;  %v510_v27 = vmul.f32 %v508_v22, %v507_v3  ;;  %v511_v29 = vmul.f32 %v509_v23, %v506_v59  ;;  %v611_v59 = vld [vmem:[#allocation5 + $0x18] sm:$0x30]  ;;  %s1851_s20 = smov 93  }
 0x2d1   : > { %v574_v60 = vpop.permute.xlu0 %573  ;;  %v515_v61 = vpop.permute.xlu1 %514 }
 0x2d3   : > { %1088 = vrot.lane.b32.xlu0 %v2185_v54, %s1844_s15  ;;  %1016 = vrot.lane.b32.xlu1 %v2183_v53, %s1840_s26  ;;  %s1852_s26 = smov 83  }
 0x2d5   : > { %v587_v62 = vpop.permute.xlu0 %586  ;;  %v517_v63 = vpop.permute.xlu1 %516 }
 0x2d6   : > { %v519_v7 = vsel %vm518_vm3, %v515_v61, %v517_v63  ;;  %v520_v8 = vsel %vm518_vm3, %v517_v63, %v515_v61  ;;  %vm798_vm3 = vcmp.lt.s32.totalorder %v2246_v13, 16 }
 0x2d7   : > { %1177 = vrot.lane.b32.xlu0 %v2185_v54, %s1845_s16  ;;  %1105 = vrot.lane.b32.xlu1 %v2183_v53, %s1841_s10  ;;  %v525_v33 = vrot.slane %v520_v8, 6  ;;  %v526_v34 = vrot.slane %v519_v7, 6  ;;  %s1853_s10 = smov 78  }
 0x2d9   : > { %v2265_v9 = vpop.permute.xlu0 %605  ;;  %v534_v17 = vpop.permute.xlu1 %533  ;;  %v529_v48 = vmul.f32 %v525_v33, %v521_v32  ;;  %v530_v49 = vmul.f32 %v526_v34, %v522_v39  ;;  %v649_v32 = vld [vmem:[#allocation5 + $0x28] sm:$0x3] }
 0x2da   : > { %v2267_v5 = vsel %vm537_vm4, %v534_v17, %v536_v55  ;;  %v2269_v6 = vsel %vm537_vm4, %v536_v55, %v534_v17  ;;  %vm817_vm4 = vcmp.lt.s32.totalorder %v2246_v13, 15 }
 0x2db   : > { %1056 = vrot.lane.b32.xlu0 %v2185_v54, %s1846_s18  ;;  %984 = vrot.lane.b32.xlu1 %v2183_v53, %s1842_s30  ;;  %v544_v46 = vrot.slane %v2269_v6, 4  ;;  %v545_v47 = vrot.slane %v2267_v5, 4  ;;  %v559_v5 = vld [vmem:[#allocation5] sm:$0xc0]  ;;  %v560_v6 = vld [vmem:[#allocation5 + $0x8] sm:$0xc0] }
 0x2dc   : > { %s1854_s30 = smov 94  }
 0x2dd   : > { %v2276_v20 = vpop.permute.xlu0 %624  ;;  %v553_v2 = vpop.permute.xlu1 %552  ;;  %v548_v8 = vmul.f32 %v544_v46, %v540_v50  ;;  %v549_v17 = vmul.f32 %v545_v47, %v541_v51  ;;  %v661_v50 = vld [vmem:[#allocation5 + $0x20] sm:$0xc]  ;;  %v662_v51 = vld [vmem:[#allocation5 + $0x28] sm:$0xc] }
 0x2de   : > { %v2278_v21 = vsel %vm556_vm5, %v553_v2, %v555_v57  ;;  %v2280_v1 = vsel %vm556_vm5, %v555_v57, %v553_v2  ;;  %vm906_vm5 = vcmp.lt.s32.totalorder %v2246_v13, 1 }
 0x2df   : > { %1139 = vrot.lane.b32.xlu0 %v2185_v54, %s1847_s7  ;;  %1067 = vrot.lane.b32.xlu1 %v2183_v53, %s1843_s8  ;;  %v564_v2 = vrot.slane %v2278_v21, 2  ;;  %s1855_s8 = smov 80  }
 0x2e1   : > { %v2287_v10 = vpop.permute.xlu0 %643  ;;  %v572_v26 = vpop.permute.xlu1 %571  ;;  %v568_v34 = vmul.f32 %v564_v2, %v560_v6 }
 0x2e2   : > { %v576_v11 = vsel %vm575_vm6, %v572_v26, %v574_v60  ;;  %v577_v28 = vsel %vm575_vm6, %v574_v60, %v572_v26  ;;  %v629_v26 = vld [vmem:[#allocation5 + $0x10] sm:$0xc0]  ;;  %vm785_vm6 = vcmp.lt.s32.totalorder %v2246_v13, 17 }
 0x2e3   : > { %v580_v30 = vmul.f32 %v578_v24, %v577_v28  ;;  %v581_v31 = vmul.f32 %v579_v25, %v576_v11  ;;  %1158 = vrot.lane.b32.xlu0 %v2185_v54, %s1848_s11  ;;  %1086 = vrot.lane.b32.xlu1 %v2183_v53, %s1844_s15  ;;  %s1856_s15 = smov 79  }
 0x2e5   : > { %v2294_v35 = vadd.f32 %v580_v30, %v510_v27  ;;  %v2296_v36 = vadd.f32 %v581_v31, %v511_v29  ;;  %v2298_v37 = vpop.permute.xlu0 %656  ;;  %v585_v38 = vpop.permute.xlu1 %584  ;;  %v630_v27 = vld [vmem:[#allocation5 + $0x18] sm:$0xc0]  ;;  %v648_v31 = vld [vmem:[#allocation5 + $0x20] sm:$0x3] }
 0x2e6   : > { %v589_v42 = vsel %vm588_vm7, %v585_v38, %v587_v62  ;;  %v590_v43 = vsel %vm588_vm7, %v587_v62, %v585_v38  ;;  %vm868_vm7 = vcmp.lt.s32.totalorder %v2246_v13, 3 }
 0x2e7   : > { %v595_v44 = vrot.slane %v590_v43, 6  ;;  %v596_v45 = vrot.slane %v589_v42, 6  ;;  %1247 = vrot.lane.b32.xlu0 %v2185_v54, %s1849_s27  ;;  %1175 = vrot.lane.b32.xlu1 %v2183_v53, %s1845_s16  ;;  %s1857_s16 = smov 81  }
 0x2e9   : > { %v599_v52 = vmul.f32 %v595_v44, %v591_v40  ;;  %v600_v55 = vmul.f32 %v596_v45, %v592_v41  ;;  %v2307_v56 = vpop.permute.xlu0 %675  ;;  %v604_v57 = vpop.permute.xlu1 %603 }
 0x2ea   : > { %v608_v3 = vsel %vm607_vm8, %v604_v57, %v2265_v9  ;;  %v609_v60 = vsel %vm607_vm8, %v2265_v9, %v604_v57  ;;  %v563_v9 = vrot.slane %v2280_v1, 2  ;;  %vm887_vm8 = vcmp.lt.s32.totalorder %v2246_v13, 2 }
 0x2eb   : > { %v2312_v61 = vadd.f32 %v599_v52, %v529_v48  ;;  %v2314_v62 = vadd.f32 %v600_v55, %v530_v49  ;;  %v614_v63 = vrot.slane %v609_v60, 4  ;;  %v615_v7 = vrot.slane %v608_v3, 4  ;;  %1126 = vrot.lane.b32.xlu0 %v2185_v54, %s1850_s29  ;;  %1054 = vrot.lane.b32.xlu1 %v2183_v53, %s1846_s18  ;;  %v680_v60 = vld [vmem:[#allocation5 + $0x20] sm:$0x30]  ;;  %s1858_s18 = smov 77  }
 0x2ec   : > { %v567_v33 = vmul.f32 %v563_v9, %v559_v5 }
 0x2ed   : > { %v618_v22 = vmul.f32 %v614_v63, %v610_v58  ;;  %v619_v23 = vmul.f32 %v615_v7, %v611_v59  ;;  %v2322_v24 = vpop.permute.xlu0 %694  ;;  %v623_v25 = vpop.permute.xlu1 %622  ;;  %v681_v63 = vld [vmem:[#allocation5 + $0x28] sm:$0x30] }
 0x2ee   : > { %v627_v11 = vsel %vm626_vm9, %v623_v25, %v2276_v20  ;;  %v628_v28 = vsel %vm626_vm9, %v2276_v20, %v623_v25  ;;  %v700_v25 = vld [vmem:[#allocation5 + $0x28] sm:$0xc0]  ;;  %vm969_vm9 = vcmp.lt.s32.totalorder %v2246_v13, 125 }
 0x2ef   : > { %v2331_v1 = vadd.f32 %v618_v22, %v548_v8  ;;  %v2333_v21 = vadd.f32 %v619_v23, %v549_v17  ;;  %v633_v29 = vrot.slane %v628_v28, 2  ;;  %v634_v30 = vrot.slane %v627_v11, 2  ;;  %1209 = vrot.lane.b32.xlu0 %v2185_v54, %s1851_s20  ;;  %1137 = vrot.lane.b32.xlu1 %v2183_v53, %s1847_s7  ;;  %s1540_s7 = sshll.u32 %s1917_s25, 10  ;;  %s1421_s25 = scalar_lea.sflag [#allocation4], %s2041_s12 }
 0x2f1   : > { %v637_v20 = vmul.f32 %v633_v29, %v629_v26  ;;  %v638_v38 = vmul.f32 %v634_v30, %v630_v27  ;;  %v2339_v39 = vpop.permute.xlu0 %713  ;;  %v642_v40 = vpop.permute.xlu1 %641  ;;  %v718_v29 = vld [vmem:[#allocation5 + $0x30] sm:$0x3]  ;;  %v719_v30 = vld [vmem:[#allocation5 + $0x38] sm:$0x3] }
 0x2f2   : > { %v646_v41 = vsel %vm645_vm10, %v642_v40, %v2287_v10  ;;  %v647_v42 = vsel %vm645_vm10, %v2287_v10, %v642_v40  ;;  %vm855_vm10 = vcmp.lt.s32.totalorder %v2246_v13, 13 }
 0x2f3   : > { %v639_v43 = vadd.f32 %v637_v20, %v567_v33  ;;  %v640_v44 = vadd.f32 %v638_v38, %v568_v34  ;;  %v650_v45 = vmul.f32 %v648_v31, %v647_v42  ;;  %v651_v46 = vmul.f32 %v649_v32, %v646_v41  ;;  %1228 = vrot.lane.b32.xlu0 %v2185_v54, %s1852_s26 }
 0x2f4   : > { %1156 = vrot.lane.b32.xlu1 %v2183_v53, %s1848_s11  ;;  %s284_s11 = scalar_lea.vmem [#allocation7], %s1525_s17 }
 0x2f5   : > { %v652_v47 = vadd.f32 %v650_v45, %v2294_v35  ;;  %v653_v48 = vadd.f32 %v651_v46, %v2296_v36  ;;  %v2354_v49 = vpop.permute.xlu0 %726  ;;  %v655_v10 = vpop.permute.xlu1 %654  ;;  %v731_v46 = vld [vmem:[#allocation5 + $0x30] sm:$0xc] }
 0x2f6   : > { %v659_v52 = vsel %vm658_vm11, %v655_v10, %v2298_v37  ;;  %v660_v55 = vsel %vm658_vm11, %v2298_v37, %v655_v10  ;;  %v732_v10 = vld [vmem:[#allocation5 + $0x38] sm:$0xc]  ;;  %vm931_vm11 = vcmp.lt.s32.totalorder %v2246_v13, 127 }
 0x2f7   : > { %v665_v57 = vrot.slane %v660_v55, 6  ;;  %v666_v58 = vrot.slane %v659_v52, 6  ;;  %1317 = vrot.lane.b32.xlu0 %v2185_v54, %s1853_s10 }
 0x2f8   : > { %1245 = vrot.lane.b32.xlu1 %v2183_v53, %s1849_s27  ;;  %s1434_s27 = sshll.u32 %s284_s11, 4  ;;  %s2506_s27 = int_to_ptr.vmem [resolvable:$true] %s1434_s27 }
 0x2f9   : > { %v669_v35 = vmul.f32 %v665_v57, %v661_v50  ;;  %v670_v36 = vmul.f32 %v666_v58, %v662_v51  ;;  %v2363_v59 = vpop.permute.xlu0 %762  ;;  %v674_v3 = vpop.permute.xlu1 %673  ;;  %v750_v57 = vld [vmem:[#allocation5 + $0x30] sm:$0x30]  ;;  %v751_v58 = vld [vmem:[#allocation5 + $0x38] sm:$0x30]  ;;  %s1734_s17 = scalar_lea.vmem %s2506_s27, 1024 }
 0x2fa   : > { %v678_v37 = vsel %vm677_vm12, %v674_v3, %v2307_v56  ;;  %v679_v7 = vsel %vm677_vm12, %v2307_v56, %v674_v3  ;;  %v699_v56 = vld [vmem:[#allocation5 + $0x20] sm:$0xc0]  ;;  %vm950_vm12 = vcmp.lt.s32.totalorder %v2246_v13, 126  ;;  %p1735_p4 = scmp.ne.s32.totalorder %s2506_s27, %s1734_s17 }
 0x2fb   : > { %v671_v8 = vadd.f32 %v669_v35, %v2312_v61  ;;  %v672_v17 = vadd.f32 %v670_v36, %v2314_v62  ;;  %v684_v5 = vrot.slane %v679_v7, 4  ;;  %v685_v6 = vrot.slane %v678_v37, 4  ;;  %1196 = vrot.lane.b32.xlu0 %v2185_v54, %s1854_s30 }
 0x2fc   : > { %1124 = vrot.lane.b32.xlu1 %v2183_v53, %s1850_s29  ;;  %p1736_p6 = pnand %p1735_p4, %p1990_p12 }
 0x2fd   : > { %v688_v9 = vmul.f32 %v684_v5, %v680_v60  ;;  %v689_v2 = vmul.f32 %v685_v6, %v681_v63  ;;  %v746_v22 = vpop.permute.xlu0 %745  ;;  %v693_v23 = vpop.permute.xlu1 %692 }
 0x2fe   : > { %v697_v26 = vsel %vm696_vm13, %v693_v23, %v2322_v24  ;;  %v698_v61 = vsel %vm696_vm13, %v2322_v24, %v693_v23  ;;  %vm1039_vm13 = vcmp.lt.s32.totalorder %v2246_v13, 112  ;;  %p1737_p8 = pneg %p1736_p6 }
 0x2ff   : > { %v690_v62 = vadd.f32 %v688_v9, %v2331_v1  ;;  %v691_v27 = vadd.f32 %v689_v2, %v2333_v21  ;;  %v703_v11 = vrot.slane %v698_v61, 2  ;;  %v704_v28 = vrot.slane %v697_v26, 2  ;;  %1279 = vrot.lane.b32.xlu0 %v2185_v54, %s1855_s8  ;;  %v769_v9 = vld [vmem:[#allocation5 + $0x30] sm:$0xc0]  ;;  %v770_v2 = vld [vmem:[#allocation5 + $0x38] sm:$0xc0] }
 0x300   : > { %1207 = vrot.lane.b32.xlu1 %v2183_v53, %s1851_s20 }
 0x301   : > { %v707_v31 = vmul.f32 %v703_v11, %v699_v56  ;;  %v708_v32 = vmul.f32 %v704_v28, %v700_v25  ;;  %v2383_v24 = vpop.permute.xlu0 %834  ;;  %v712_v33 = vpop.permute.xlu1 %711 }
 0x302   : > { %v716_v1 = vsel %vm715_vm14, %v712_v33, %v2339_v39  ;;  %v717_v21 = vsel %vm715_vm14, %v2339_v39, %v712_v33  ;;  %vm1001_vm14 = vcmp.lt.s32.totalorder %v2246_v13, 114 }
 0x303   : > { %v709_v34 = vadd.f32 %v707_v31, %v639_v43  ;;  %v710_v20 = vadd.f32 %v708_v32, %v640_v44  ;;  %v720_v38 = vmul.f32 %v718_v29, %v717_v21  ;;  %v721_v40 = vmul.f32 %v719_v30, %v716_v1  ;;  %1298 = vrot.lane.b32.xlu0 %v2185_v54, %s1856_s15  ;;  %v839_v29 = vld [vmem:[#allocation5 + $0x40] sm:$0xc0]  ;;  %v840_v30 = vld [vmem:[#allocation5 + $0x48] sm:$0xc0] }
 0x304   : > { %1226 = vrot.lane.b32.xlu1 %v2183_v53, %s1852_s26  ;;  %s2500_s26 = scalar_lea.hbm %s2557_s6, %s1540_s7 }
 0x305   : > { %v2392_v41 = vadd.f32 %v720_v38, %v652_v47  ;;  %v2394_v42 = vadd.f32 %v721_v40, %v653_v48  ;;  %v2396_v45 = vpop.permute.xlu0 %796  ;;  %v725_v39 = vpop.permute.xlu1 %724 }
 0x306   : > { %v729_v43 = vsel %vm728_vm15, %v725_v39, %v2354_v49  ;;  %v730_v44 = vsel %vm728_vm15, %v2354_v49, %v725_v39  ;;  %v801_v39 = vld [vmem:[#allocation5 + $0x40] sm:$0xc]  ;;  %vm1020_vm15 = vcmp.lt.s32.totalorder %v2246_v13, 113 }
 0x307   : > { %v735_v50 = vrot.slane %v730_v44, 6  ;;  %v736_v51 = vrot.slane %v729_v43, 6  ;;  %1266 = vrot.lane.b32.xlu0 %v2185_v54, %s1857_s16 }
 0x308   : > { %1315 = vrot.lane.b32.xlu1 %v2183_v53, %s1853_s10  ;;  %s1859_s10 = smov [#allocation7]  }
 0x309   : > { %v739_v47 = vmul.f32 %v735_v50, %v731_v46  ;;  %v740_v48 = vmul.f32 %v736_v51, %v732_v10  ;;  %v2405_v52 = vpop.permute.xlu0 %815  ;;  %v744_v55 = vpop.permute.xlu1 %743  ;;  %v802_v46 = vld [vmem:[#allocation5 + $0x48] sm:$0xc] }
 0x30a   : > { %v748_v35 = vsel %vm747_vm0, %v744_v55, %v746_v22  ;;  %v749_v49 = vsel %vm747_vm0, %v746_v22, %v744_v55  ;;  %v820_v55 = vld [vmem:[#allocation5 + $0x40] sm:$0x30]  ;;  %vm1109_vm0 = vcmp.lt.s32.totalorder %v2246_v13, 99 }
 0x30b   : > { %v741_v36 = vadd.f32 %v739_v47, %v671_v8  ;;  %v742_v3 = vadd.f32 %v740_v48, %v672_v17  ;;  %v754_v60 = vrot.slane %v749_v49, 4  ;;  %v755_v63 = vrot.slane %v748_v35, 4  ;;  %1336 = vrot.lane.b32.xlu0 %v2185_v54, %s1858_s18 }
 0x30c   : > { %1194 = vrot.lane.b32.xlu1 %v2183_v53, %s1854_s30  ;;  %s1738_s30 = sshll.u32 %s1859_s10, 4  ;;  %s1739_s30 = int_to_ptr.vmem [resolvable:$false] %s1738_s30 }
 0x30d   : > { %v758_v37 = vmul.f32 %v754_v60, %v750_v57  ;;  %v759_v7 = vmul.f32 %v755_v63, %v751_v58  ;;  %v905_v5 = vpop.permute.xlu0 %904  ;;  %v765_v6 = vpop.permute.xlu1 %764  ;;  %v821_v57 = vld [vmem:[#allocation5 + $0x48] sm:$0x30]  ;;  %p1741_p10 = scmp.lt.s32.totalorder %s2506_s27, %s1739_s30 }
 0x30e   : > { %v767_v22 = vsel %vm766_vm1, %v2363_v59, %v765_v6  ;;  %v768_v8 = vsel %vm766_vm1, %v765_v6, %v2363_v59  ;;  %vm988_vm1 = vcmp.lt.s32.totalorder %v2246_v13, 115 }
 0x30f   : > { %v760_v17 = vadd.f32 %v758_v37, %v690_v62  ;;  %v761_v23 = vadd.f32 %v759_v7, %v691_v27  ;;  %v773_v56 = vrot.slane %v768_v8, 2  ;;  %v774_v25 = vrot.slane %v767_v22, 2  ;;  %v910_v22 = vld [vmem:[#allocation5 + $0x58] sm:$0xc0] }
 0x310   : > { %1277 = vrot.lane.b32.xlu1 %v2183_v53, %s1855_s8  ;;  %s1740_s8 = scalar_lea.vmem %s1739_s30, 2048 }
 0x311   : > { %v777_v26 = vmul.f32 %v773_v56, %v769_v9  ;;  %v778_v61 = vmul.f32 %v774_v25, %v770_v2  ;;  %v784_v11 = vpop.permute.xlu0 %783  ;;  %v833_v28 = vpop.permute.xlu1 %832  ;;  %v909_v2 = vld [vmem:[#allocation5 + $0x50] sm:$0xc0]  ;;  %p1742_p13 = scmp.lt.s32.totalorder %s1740_s8, %s1734_s17 }
 0x312   : > { %v837_v31 = vsel %vm836_vm2, %v833_v28, %v2383_v24  ;;  %v838_v32 = vsel %vm836_vm2, %v2383_v24, %v833_v28  ;;  %vm1071_vm2 = vcmp.lt.s32.totalorder %v2246_v13, 110 }
 0x313   : > { %v779_v59 = vadd.f32 %v777_v26, %v709_v34  ;;  %v780_v62 = vadd.f32 %v778_v61, %v710_v20  ;;  %v843_v27 = vrot.slane %v838_v32, 2  ;;  %v844_v33 = vrot.slane %v837_v31, 2  ;;  %v789_v61 = vld [vmem:[#allocation5 + $0x48] sm:$0x3]  ;;  %p1743_p3 = por %p1742_p13, %p1741_p10 }
 0x314   : > { %1296 = vrot.lane.b32.xlu1 %v2183_v53, %s1856_s15 }
 0x315   : > { %v847_v1 = vmul.f32 %v843_v27, %v839_v29  ;;  %v848_v21 = vmul.f32 %v844_v33, %v840_v30  ;;  %v867_v38 = vpop.permute.xlu0 %866  ;;  %v795_v40 = vpop.permute.xlu1 %794  ;;  %p1744_p7 = pnand %p1743_p3, %p1737_p8 }
 0x316   : > { %v799_v10 = vsel %vm798_vm3, %v795_v40, %v2396_v45  ;;  %v800_v43 = vsel %vm798_vm3, %v2396_v45, %v795_v40  ;;  %v871_v40 = vld [vmem:[#allocation5 + $0x50] sm:$0xc]  ;;  %vm1090_vm3 = vcmp.lt.s32.totalorder %v2246_v13, 109 }
 0x317   : > { %v849_v24 = vadd.f32 %v847_v1, %v779_v59  ;;  %v850_v34 = vadd.f32 %v848_v21, %v780_v62  ;;  %v805_v20 = vrot.slane %v800_v43, 6  ;;  %v806_v44 = vrot.slane %v799_v10, 6 }
 0x318   : > { %1264 = vrot.lane.b32.xlu1 %v2183_v53, %s1857_s16 }
 0x319   : > { %v809_v50 = vmul.f32 %v805_v20, %v801_v39  ;;  %v810_v51 = vmul.f32 %v806_v44, %v802_v46  ;;  %v886_v47 = vpop.permute.xlu0 %885  ;;  %v814_v48 = vpop.permute.xlu1 %813  ;;  %v872_v39 = vld [vmem:[#allocation5 + $0x58] sm:$0xc] }
 0x31a   : > { %v818_v58 = vsel %vm817_vm4, %v814_v48, %v2405_v52  ;;  %v819_v35 = vsel %vm817_vm4, %v2405_v52, %v814_v48  ;;  %vm1179_vm4 = vcmp.lt.s32.totalorder %v2246_v13, 95 }
 0x31b   : > { %v811_v45 = vadd.f32 %v809_v50, %v741_v36  ;;  %v812_v49 = vadd.f32 %v810_v51, %v742_v3  ;;  %v824_v60 = vrot.slane %v819_v35, 4  ;;  %v825_v63 = vrot.slane %v818_v58, 4  ;;  %v788_v3 = vld [vmem:[#allocation5 + $0x40] sm:$0x3]  ;;  %v890_v50 = vld [vmem:[#allocation5 + $0x50] sm:$0x30] }
 0x31c   : > { %1334 = vrot.lane.b32.xlu1 %v2183_v53, %s1858_s18  ;;  %v891_v51 = vld [vmem:[#allocation5 + $0x58] sm:$0x30] }
 0x31d   : > { %v828_v37 = vmul.f32 %v824_v60, %v820_v55  ;;  %v829_v7 = vmul.f32 %v825_v63, %v821_v57  ;;  %v968_v6 = vpop.permute.xlu0 %967  ;;  %v903_v9 = vpop.permute.xlu1 %902 }
 0x31e   : > { %v907_v8 = vsel %vm906_vm5, %v903_v9, %v905_v5  ;;  %v908_v56 = vsel %vm906_vm5, %v905_v5, %v903_v9  ;;  %vm1058_vm5 = vcmp.lt.s32.totalorder %v2246_v13, 111 }
 0x31f   : > { %v830_v52 = vadd.f32 %v828_v37, %v760_v17  ;;  %v831_v25 = vadd.f32 %v829_v7, %v761_v23  ;;  %v913_v26 = vrot.slane %v908_v56, 2  ;;  %v914_v36 = vrot.slane %v907_v8, 2  ;;  %v972_v37 = vld [vmem:[#allocation5 + $0x60] sm:$0xc0]  ;;  %v973_v7 = vld [vmem:[#allocation5 + $0x68] sm:$0xc0] }
 0x321   : > { %v917_v28 = vmul.f32 %v913_v26, %v909_v2  ;;  %v918_v29 = vmul.f32 %v914_v36, %v910_v22  ;;  %v854_v30 = vpop.permute.xlu0 %853  ;;  %v782_v31 = vpop.permute.xlu1 %781  ;;  %v858_v26 = vld [vmem:[#allocation5 + $0x50] sm:$0x3]  ;;  %v859_v36 = vld [vmem:[#allocation5 + $0x58] sm:$0x3] }
 0x322   : > { %v786_v32 = vsel %vm785_vm6, %v782_v31, %v784_v11  ;;  %v787_v59 = vsel %vm785_vm6, %v784_v11, %v782_v31  ;;  %vm1141_vm6 = vcmp.lt.s32.totalorder %v2246_v13, 97 }
 0x323   : > { %v919_v62 = vadd.f32 %v917_v28, %v849_v24  ;;  %v920_v27 = vadd.f32 %v918_v29, %v850_v34  ;;  %v790_v33 = vmul.f32 %v788_v3, %v787_v59  ;;  %v791_v5 = vmul.f32 %v789_v61, %v786_v32 }
 0x325   : > { %v792_v1 = vadd.f32 %v790_v33, %v2392_v41  ;;  %v793_v17 = vadd.f32 %v791_v5, %v2394_v42  ;;  %v930_v23 = vpop.permute.xlu0 %929  ;;  %v865_v21 = vpop.permute.xlu1 %864 }
 0x326   : > { %v869_v46 = vsel %vm868_vm7, %v865_v21, %v867_v38  ;;  %v870_v10 = vsel %vm868_vm7, %v867_v38, %v865_v21  ;;  %v934_v21 = vld [vmem:[#allocation5 + $0x60] sm:$0xc]  ;;  %vm1160_vm7 = vcmp.lt.s32.totalorder %v2246_v13, 96 }
 0x327   : > { %v875_v43 = vrot.slane %v870_v10, 6  ;;  %v876_v20 = vrot.slane %v869_v46, 6 }
 0x329   : > { %v879_v11 = vmul.f32 %v875_v43, %v871_v40  ;;  %v880_v44 = vmul.f32 %v876_v20, %v872_v39  ;;  %v949_v24 = vpop.permute.xlu0 %948  ;;  %v884_v34 = vpop.permute.xlu1 %883  ;;  %v935_v40 = vld [vmem:[#allocation5 + $0x68] sm:$0xc] }
 0x32a   : > { %v888_v48 = vsel %vm887_vm8, %v884_v34, %v886_v47  ;;  %v889_v41 = vsel %vm887_vm8, %v886_v47, %v884_v34  ;;  %vm1249_vm8 = vcmp.lt.s32.totalorder %v2246_v13, 82 }
 0x32b   : > { %v881_v42 = vadd.f32 %v879_v11, %v811_v45  ;;  %v882_v55 = vadd.f32 %v880_v44, %v812_v49  ;;  %v894_v57 = vrot.slane %v889_v41, 4  ;;  %v895_v58 = vrot.slane %v888_v48, 4  ;;  %v953_v11 = vld [vmem:[#allocation5 + $0x60] sm:$0x30]  ;;  %v954_v44 = vld [vmem:[#allocation5 + $0x68] sm:$0x30] }
 0x32d   : > { %v898_v35 = vmul.f32 %v894_v57, %v890_v50  ;;  %v899_v38 = vmul.f32 %v895_v58, %v891_v51  ;;  %v1038_v60 = vpop.permute.xlu0 %1037  ;;  %v966_v63 = vpop.permute.xlu1 %965 }
 0x32e   : > { %v970_v9 = vsel %vm969_vm9, %v966_v63, %v968_v6  ;;  %v971_v2 = vsel %vm969_vm9, %v968_v6, %v966_v63  ;;  %vm1128_vm9 = vcmp.lt.s32.totalorder %v2246_v13, 98 }
 0x32f   : > { %v900_v22 = vadd.f32 %v898_v35, %v830_v52  ;;  %v901_v8 = vadd.f32 %v899_v38, %v831_v25  ;;  %v976_v56 = vrot.slane %v970_v9, 2  ;;  %v977_v47 = vrot.slane %v971_v2, 2  ;;  %v1042_v35 = vld [vmem:[#allocation5 + $0x70] sm:$0xc0]  ;;  %v1043_v38 = vld [vmem:[#allocation5 + $0x78] sm:$0xc0] }
 0x331   : > { %v980_v45 = vmul.f32 %v976_v56, %v972_v37  ;;  %v981_v49 = vmul.f32 %v977_v47, %v973_v7  ;;  %v1000_v3 = vpop.permute.xlu0 %999  ;;  %v852_v61 = vpop.permute.xlu1 %851 }
 0x332   : > { %v856_v28 = vsel %vm855_vm10, %v852_v61, %v854_v30  ;;  %v857_v29 = vsel %vm855_vm10, %v854_v30, %v852_v61  ;;  %vm1211_vm10 = vcmp.lt.s32.totalorder %v2246_v13, 93 }
 0x333   : > { %v982_v31 = vadd.f32 %v980_v45, %v919_v62  ;;  %v983_v32 = vadd.f32 %v981_v49, %v920_v27  ;;  %v860_v59 = vmul.f32 %v858_v26, %v857_v29  ;;  %v861_v6 = vmul.f32 %v859_v36, %v856_v28  ;;  %v1004_v26 = vld [vmem:[#allocation5 + $0x70] sm:$0xc]  ;;  %v1005_v36 = vld [vmem:[#allocation5 + $0x78] sm:$0xc] }
 0x335   : > { %v2440_v33 = vadd.f32 %v860_v59, %v792_v1  ;;  %v2442_v52 = vadd.f32 %v861_v6, %v793_v17  ;;  %v1019_v25 = vpop.permute.xlu0 %1018  ;;  %v928_v5 = vpop.permute.xlu1 %927 }
 0x336   : > { %v932_v39 = vsel %vm931_vm11, %v928_v5, %v930_v23  ;;  %v933_v46 = vsel %vm931_vm11, %v930_v23, %v928_v5  ;;  %v1023_v5 = vld [vmem:[#allocation5 + $0x70] sm:$0x30]  ;;  %vm1230_vm11 = vcmp.lt.s32.totalorder %v2246_v13, 83 }
 0x337   : > { %v938_v10 = vrot.slane %v932_v39, 6  ;;  %v939_v43 = vrot.slane %v933_v46, 6 }
 0x339   : > { %v942_v30 = vmul.f32 %v938_v10, %v934_v21  ;;  %v943_v20 = vmul.f32 %v939_v43, %v935_v40  ;;  %v1108_v62 = vpop.permute.xlu0 %1107  ;;  %v947_v27 = vpop.permute.xlu1 %946  ;;  %v1024_v21 = vld [vmem:[#allocation5 + $0x78] sm:$0x30] }
 0x33a   : > { %v951_v1 = vsel %vm950_vm12, %v947_v27, %v949_v24  ;;  %v952_v34 = vsel %vm950_vm12, %v949_v24, %v947_v27  ;;  %v921_v27 = vld [vmem:[#allocation5 + $0x60] sm:$0x3]  ;;  %vm1319_vm12 = vcmp.lt.s32.totalorder %v2246_v13, 78 }
 0x33b   : > { %v944_v17 = vadd.f32 %v942_v30, %v881_v42  ;;  %v945_v50 = vadd.f32 %v943_v20, %v882_v55  ;;  %v957_v51 = vrot.slane %v951_v1, 4  ;;  %v958_v48 = vrot.slane %v952_v34, 4  ;;  %v1113_v1 = vld [vmem:[#allocation5 + $0x88] sm:$0xc0] }
 0x33d   : > { %v961_v41 = vmul.f32 %v957_v51, %v953_v11  ;;  %v962_v23 = vmul.f32 %v958_v48, %v954_v44  ;;  %v2446_v57 = vpop.permute.xlu0 %986  ;;  %v1036_v58 = vpop.permute.xlu1 %1035  ;;  %v922_v11 = vld [vmem:[#allocation5 + $0x68] sm:$0x3]  ;;  %v1112_v44 = vld [vmem:[#allocation5 + $0x80] sm:$0xc0] }
 0x33e   : > { %v1040_v63 = vsel %vm1039_vm13, %v1036_v58, %v1038_v60  ;;  %v1041_v37 = vsel %vm1039_vm13, %v1038_v60, %v1036_v58  ;;  %v992_v58 = vld [vmem:[#allocation5 + $0x78] sm:$0x3]  ;;  %vm1198_vm13 = vcmp.lt.s32.totalorder %v2246_v13, 94 }
 0x33f   : > { %v963_v7 = vadd.f32 %v961_v41, %v900_v22  ;;  %v964_v9 = vadd.f32 %v962_v23, %v901_v8  ;;  %v1046_v24 = vrot.slane %v1040_v63, 2  ;;  %v1047_v2 = vrot.slane %v1041_v37, 2 }
 0x341   : > { %v1050_v56 = vmul.f32 %v1046_v24, %v1042_v35  ;;  %v1051_v42 = vmul.f32 %v1047_v2, %v1043_v38  ;;  %v2449_v55 = vpop.permute.xlu0 %1069  ;;  %v998_v47 = vpop.permute.xlu1 %997  ;;  %v923_v35 = vmul.f32 %v921_v27, %v2183_v53 }
 0x342   : > { %v1002_v45 = vsel %vm1001_vm14, %v998_v47, %v1000_v3  ;;  %v1003_v49 = vsel %vm1001_vm14, %v1000_v3, %v998_v47  ;;  %vm1281_vm14 = vcmp.lt.s32.totalorder %v2246_v13, 80 }
 0x343   : > { %v1052_v61 = vadd.f32 %v1050_v56, %v982_v31  ;;  %v1053_v28 = vadd.f32 %v1051_v42, %v983_v32  ;;  %v1008_v60 = vrot.slane %v1002_v45, 6  ;;  %v1009_v29 = vrot.slane %v1003_v49, 6  ;;  %v1074_v49 = vld [vmem:[#allocation5 + $0x80] sm:$0xc] }
 0x344   : > { %v925_v2 = vadd.f32 %v923_v35, %v2440_v33 }
 0x345   : > { %v1012_v59 = vmul.f32 %v1008_v60, %v1004_v26  ;;  %v1013_v22 = vmul.f32 %v1009_v29, %v1005_v36  ;;  %v1089_v8 = vpop.permute.xlu0 %1088  ;;  %v1017_v6 = vpop.permute.xlu1 %1016 }
 0x346   : > { %v1021_v40 = vsel %vm1020_vm15, %v1017_v6, %v1019_v25  ;;  %v1022_v39 = vsel %vm1020_vm15, %v1019_v25, %v1017_v6  ;;  %v1093_v6 = vld [vmem:[#allocation5 + $0x80] sm:$0x30]  ;;  %vm1300_vm15 = vcmp.lt.s32.totalorder %v2246_v13, 79 }
 0x347   : > { %v1014_v46 = vadd.f32 %v1012_v59, %v944_v17  ;;  %v1015_v10 = vadd.f32 %v1013_v22, %v945_v50  ;;  %v1027_v43 = vrot.slane %v1021_v40, 4  ;;  %v1028_v3 = vrot.slane %v1022_v39, 4  ;;  %v991_v50 = vld [vmem:[#allocation5 + $0x70] sm:$0x3] }
 0x348   : > { %v924_v17 = vmul.f32 %v922_v11, %v2185_v54  ;;  %v1182_v11 = vld [vmem:[#allocation5 + $0x90] sm:$0xc0] }
 0x349   : > { %v1031_v30 = vmul.f32 %v1027_v43, %v1023_v5  ;;  %v1032_v20 = vmul.f32 %v1028_v3, %v1024_v21  ;;  %v1178_v31 = vpop.permute.xlu0 %1177  ;;  %v1106_v32 = vpop.permute.xlu1 %1105  ;;  %v1094_v5 = vld [vmem:[#allocation5 + $0x88] sm:$0x30] }
 0x34a   : > { %v1110_v34 = vsel %vm1109_vm0, %v1106_v32, %v1108_v62  ;;  %v1111_v51 = vsel %vm1109_vm0, %v1108_v62, %v1106_v32  ;;  %v926_v62 = vadd.f32 %v924_v17, %v2442_v52  ;;  %v1075_v52 = vld [vmem:[#allocation5 + $0x88] sm:$0xc]  ;;  %v1061_v17 = vld [vmem:[#allocation5 + $0x80] sm:$0x3]  ;;  %vm1268_vm0 = vcmp.lt.s32.totalorder %v2246_v13, 81 }
 0x34b   : > { %v1033_v48 = vadd.f32 %v1031_v30, %v963_v7  ;;  %v1034_v25 = vadd.f32 %v1032_v20, %v964_v9  ;;  %v1116_v41 = vrot.slane %v1110_v34, 2  ;;  %v1117_v23 = vrot.slane %v1111_v51, 2 }
 0x34d   : > { %v1120_v38 = vmul.f32 %v1116_v41, %v1112_v44  ;;  %v1121_v63 = vmul.f32 %v1117_v23, %v1113_v1  ;;  %v1057_v37 = vpop.permute.xlu0 %1056  ;;  %v985_v24 = vpop.permute.xlu1 %984  ;;  %v1183_v44 = vld [vmem:[#allocation5 + $0x98] sm:$0xc0] }
 0x34e   : > { %v989_v7 = vsel %vm988_vm1, %v985_v24, %v2446_v57  ;;  %v990_v54 = vsel %vm988_vm1, %v2446_v57, %v985_v24  ;;  %vm1338_vm1 = vcmp.lt.s32.totalorder %v2246_v13, 77 }
 0x34f   : > { %v1122_v9 = vadd.f32 %v1120_v38, %v1052_v61  ;;  %v1123_v53 = vadd.f32 %v1121_v63, %v1053_v28  ;;  %v993_v56 = vmul.f32 %v991_v50, %v989_v7  ;;  %v994_v42 = vmul.f32 %v992_v58, %v990_v54  ;;  %v1062_v50 = vld [vmem:[#allocation5 + $0x88] sm:$0x3] }
 0x351   : > { %v995_v47 = vadd.f32 %v993_v56, %v925_v2  ;;  %v996_v26 = vadd.f32 %v994_v42, %v926_v62  ;;  %v1140_v36 = vpop.permute.xlu0 %1139  ;;  %v1068_v45 = vpop.permute.xlu1 %1067  ;;  %v1145_v56 = vld [vmem:[#allocation5 + $0x98] sm:$0xc] }
 0x352   : > { %v1072_v33 = vsel %vm1071_vm2, %v1068_v45, %v2449_v55  ;;  %v1073_v60 = vsel %vm1071_vm2, %v2449_v55, %v1068_v45  ;;  %vm1371_vm2 = vcmask 1041408  }
 0x353   : > { %v1078_v29 = vrot.slane %v1072_v33, 6  ;;  %v1079_v57 = vrot.slane %v1073_v60, 6 }
 0x355   : > { %v1082_v61 = vmul.f32 %v1078_v29, %v1074_v49  ;;  %v1083_v28 = vmul.f32 %v1079_v57, %v1075_v52  ;;  %v1159_v59 = vpop.permute.xlu0 %1158  ;;  %v1087_v22 = vpop.permute.xlu1 %1086 }
 0x356   : > { %v1091_v21 = vsel %vm1090_vm3, %v1087_v22, %v1089_v8  ;;  %v1092_v40 = vsel %vm1090_vm3, %v1089_v8, %v1087_v22 }
 0x357   : > { %v1084_v39 = vadd.f32 %v1082_v61, %v1014_v46  ;;  %v1085_v43 = vadd.f32 %v1083_v28, %v1015_v10  ;;  %v1097_v3 = vrot.slane %v1091_v21, 4  ;;  %v1098_v30 = vrot.slane %v1092_v40, 4  ;;  %v1164_v61 = vld [vmem:[#allocation5 + $0x98] sm:$0x30]  ;;  %v1252_v40 = vld [vmem:[#allocation5 + $0xa0] sm:$0xc0] }
 0x359   : > { %v1101_v20 = vmul.f32 %v1097_v3, %v1093_v6  ;;  %v1102_v55 = vmul.f32 %v1098_v30, %v1094_v5  ;;  %v1248_v32 = vpop.permute.xlu0 %1247  ;;  %v1176_v27 = vpop.permute.xlu1 %1175  ;;  %v1253_v3 = vld [vmem:[#allocation5 + $0xa8] sm:$0xc0] }
 0x35a   : > { %v1180_v1 = vsel %vm1179_vm4, %v1176_v27, %v1178_v31  ;;  %v1181_v34 = vsel %vm1179_vm4, %v1178_v31, %v1176_v27 }
 0x35b   : > { %v1103_v51 = vadd.f32 %v1101_v20, %v1033_v48  ;;  %v1104_v41 = vadd.f32 %v1102_v55, %v1034_v25  ;;  %v1186_v23 = vrot.slane %v1180_v1, 2  ;;  %v1187_v8 = vrot.slane %v1181_v34, 2  ;;  %v1144_v25 = vld [vmem:[#allocation5 + $0x90] sm:$0xc] }
 0x35d   : > { %v1190_v46 = vmul.f32 %v1186_v23, %v1182_v11  ;;  %v1191_v10 = vmul.f32 %v1187_v8, %v1183_v44  ;;  %v1055_v58 = vpop.permute.xlu1 %1054  ;;  %v1127_v35 = vpop.permute.xlu0 %1126  ;;  %v1131_v11 = vld [vmem:[#allocation5 + $0x90] sm:$0x3] }
 0x35e   : > { %v1059_v38 = vsel %vm1058_vm5, %v1055_v58, %v1057_v37  ;;  %v1060_v63 = vsel %vm1058_vm5, %v1057_v37, %v1055_v58 }
 0x35f   : > { %v1192_v24 = vadd.f32 %v1190_v46, %v1122_v9  ;;  %v1193_v62 = vadd.f32 %v1191_v10, %v1123_v53  ;;  %v1063_v2 = vmul.f32 %v1061_v17, %v1059_v38  ;;  %v1064_v31 = vmul.f32 %v1062_v50, %v1060_v63  ;;  %v1163_v53 = vld [vmem:[#allocation5 + $0x90] sm:$0x30]  ;;  %v1215_v63 = vld [vmem:[#allocation5 + $0xa8] sm:$0xc] }
 0x361   : > { %v1065_v7 = vadd.f32 %v1063_v2, %v995_v47  ;;  %v1066_v54 = vadd.f32 %v1064_v31, %v996_v26  ;;  %v1138_v48 = vpop.permute.xlu1 %1137  ;;  %v1210_v33 = vpop.permute.xlu0 %1209 }
 0x362   : > { %v1142_v42 = vsel %vm1141_vm6, %v1138_v48, %v1140_v36  ;;  %v1143_v45 = vsel %vm1141_vm6, %v1140_v36, %v1138_v48 }
 0x363   : > { %v1148_v49 = vrot.slane %v1142_v42, 6  ;;  %v1149_v52 = vrot.slane %v1143_v45, 6 }
 0x365   : > { %v1152_v60 = vmul.f32 %v1148_v49, %v1144_v25  ;;  %v1153_v37 = vmul.f32 %v1149_v52, %v1145_v56  ;;  %v1229_v6 = vpop.permute.xlu0 %1228  ;;  %v1233_v49 = vld [vmem:[#allocation5 + $0xa0] sm:$0x30] }
 0x366   : > { %v1157_v29 = vpop.permute.xlu1 %1156 }
 0x367   : > { %v1154_v57 = vadd.f32 %v1152_v60, %v1084_v39  ;;  %v1155_v9 = vadd.f32 %v1153_v37, %v1085_v43  ;;  %v1161_v28 = vsel %vm1160_vm7, %v1157_v29, %v1159_v59  ;;  %v1162_v47 = vsel %vm1160_vm7, %v1159_v59, %v1157_v29  ;;  %v1132_v59 = vld [vmem:[#allocation5 + $0x98] sm:$0x3] }
 0x368   : > { %v1167_v26 = vrot.slane %v1161_v28, 4  ;;  %v1168_v22 = vrot.slane %v1162_v47, 4  ;;  %v1323_v28 = vld [vmem:[#allocation5 + $0xb8] sm:$0xc0] }
 0x369   : > { %v1318_v17 = vpop.permute.xlu0 %1317 }
 0x36a   : > { %v1171_v36 = vmul.f32 %v1167_v26, %v1163_v53  ;;  %v1172_v5 = vmul.f32 %v1168_v22, %v1164_v61  ;;  %v1246_v21 = vpop.permute.xlu1 %1245  ;;  %v1322_v61 = vld [vmem:[#allocation5 + $0xb0] sm:$0xc0] }
 0x36b   : > { %v1250_v30 = vsel %vm1249_vm8, %v1246_v21, %v1248_v32  ;;  %v1251_v20 = vsel %vm1249_vm8, %v1248_v32, %v1246_v21 }
 0x36c   : > { %v1173_v39 = vadd.f32 %v1171_v36, %v1103_v51  ;;  %v1174_v43 = vadd.f32 %v1172_v5, %v1104_v41  ;;  %v1256_v55 = vrot.slane %v1250_v30, 2  ;;  %v1257_v27 = vrot.slane %v1251_v20, 2  ;;  %v1214_v41 = vld [vmem:[#allocation5 + $0xa0] sm:$0xc] }
 0x36d   : > { %v1197_v56 = vpop.permute.xlu0 %1196 }
 0x36e   : > { %v1260_v44 = vmul.f32 %v1256_v55, %v1252_v40  ;;  %v1261_v1 = vmul.f32 %v1257_v27, %v1253_v3  ;;  %v1125_v34 = vpop.permute.xlu1 %1124  ;;  %v1201_v40 = vld [vmem:[#allocation5 + $0xa0] sm:$0x3]  ;;  %v1202_v3 = vld [vmem:[#allocation5 + $0xa8] sm:$0x3] }
 0x36f   : > { %v1129_v23 = vsel %vm1128_vm9, %v1125_v34, %v1127_v35  ;;  %v1130_v8 = vsel %vm1128_vm9, %v1127_v35, %v1125_v34 }
 0x370   : > { %v1262_v50 = vadd.f32 %v1260_v44, %v1192_v24  ;;  %v1263_v46 = vadd.f32 %v1261_v1, %v1193_v62  ;;  %v1133_v10 = vmul.f32 %v1131_v11, %v1129_v23  ;;  %v1134_v32 = vmul.f32 %v1132_v59, %v1130_v8  ;;  %v1234_v24 = vld [vmem:[#allocation5 + $0xa8] sm:$0x30]  ;;  %v1285_v8 = vld [vmem:[#allocation5 + $0xb8] sm:$0xc] }
 0x371   : > { %v1280_v22 = vpop.permute.xlu0 %1279 }
 0x372   : > { %v1135_v58 = vadd.f32 %v1133_v10, %v1065_v7  ;;  %v1136_v38 = vadd.f32 %v1134_v32, %v1066_v54  ;;  %v1208_v51 = vpop.permute.xlu1 %1207 }
 0x373   : > { %v1212_v2 = vsel %vm1211_vm10, %v1208_v51, %v1210_v33  ;;  %v1213_v31 = vsel %vm1211_vm10, %v1210_v33, %v1208_v51 }
 0x374   : > { %v1218_v48 = vrot.slane %v1212_v2, 6  ;;  %v1219_v25 = vrot.slane %v1213_v31, 6  ;;  %v1303_v31 = vld [vmem:[#allocation5 + $0xb0] sm:$0x30] }
 0x375   : > { %v1299_v1 = vpop.permute.xlu0 %1298 }
 0x376   : > { %v1222_v35 = vmul.f32 %v1218_v48, %v1214_v41  ;;  %v1223_v42 = vmul.f32 %v1219_v25, %v1215_v63  ;;  %v1227_v45 = vpop.permute.xlu1 %1226 }
 0x377   : > { %v1231_v62 = vsel %vm1230_vm11, %v1227_v45, %v1229_v6  ;;  %v1232_v52 = vsel %vm1230_vm11, %v1229_v6, %v1227_v45  ;;  %v1272_v45 = vld [vmem:[#allocation5 + $0xb8] sm:$0x3] }
 0x378   : > { %v1224_v7 = vadd.f32 %v1222_v35, %v1154_v57  ;;  %v1225_v54 = vadd.f32 %v1223_v42, %v1155_v9  ;;  %v1237_v60 = vrot.slane %v1231_v62, 4  ;;  %v1238_v37 = vrot.slane %v1232_v52, 4  ;;  %v1271_v42 = vld [vmem:[#allocation5 + $0xb0] sm:$0x3] }
 0x37a   : > { %v1241_v29 = vmul.f32 %v1237_v60, %v1233_v49  ;;  %v1242_v33 = vmul.f32 %v1238_v37, %v1234_v24  ;;  %v1316_v53 = vpop.permute.xlu1 %1315 }
 0x37b   : > { %v1320_v47 = vsel %vm1319_vm12, %v1316_v53, %v1318_v17  ;;  %v1321_v26 = vsel %vm1319_vm12, %v1318_v17, %v1316_v53 }
 0x37c   : > { %v1243_v36 = vadd.f32 %v1241_v29, %v1173_v39  ;;  %v1244_v5 = vadd.f32 %v1242_v33, %v1174_v43  ;;  %v1326_v21 = vrot.slane %v1320_v47, 2  ;;  %v1327_v6 = vrot.slane %v1321_v26, 2  ;;  %v1284_v43 = vld [vmem:[#allocation5 + $0xb0] sm:$0xc]  ;;  %v1341_v47 = vld [vmem:[#allocation5 + $0xc0] sm:$0x3] }
 0x37e   : > { %v1330_v57 = vmul.f32 %v1326_v21, %v1322_v61  ;;  %v1331_v9 = vmul.f32 %v1327_v6, %v1323_v28  ;;  %v1195_v30 = vpop.permute.xlu1 %1194 }
 0x37f   : > { %v1199_v20 = vsel %vm1198_vm13, %v1195_v30, %v1197_v56  ;;  %v1200_v55 = vsel %vm1198_vm13, %v1197_v56, %v1195_v30 }
 0x380   : > { %v1332_v27 = vadd.f32 %v1330_v57, %v1262_v50  ;;  %v1333_v11 = vadd.f32 %v1331_v9, %v1263_v46  ;;  %v1203_v59 = vmul.f32 %v1201_v40, %v1199_v20  ;;  %v1204_v44 = vmul.f32 %v1202_v3, %v1200_v55  ;;  %v1304_v50 = vld [vmem:[#allocation5 + $0xb8] sm:$0x30] }
 0x382   : > { %v1205_v34 = vadd.f32 %v1203_v59, %v1135_v58  ;;  %v1206_v23 = vadd.f32 %v1204_v44, %v1136_v38  ;;  %v1278_v39 = vpop.permute.xlu1 %1277  ;;  %v1267_v58 = vpop.permute.xlu0 %1266  ;;  %v1357_v52 = vrot.slane %v1332_v27, 2  ;;  %v1358_v60 = vrot.slane %v1333_v11, 2 }
 0x383   : > { %v1282_v17 = vsel %vm1281_vm14, %v1278_v39, %v1280_v22  ;;  %v1283_v10 = vsel %vm1281_vm14, %v1280_v22, %v1278_v39 }
 0x384   : > { %v1288_v32 = vrot.slane %v1282_v17, 6  ;;  %v1289_v51 = vrot.slane %v1283_v10, 6 }
 0x386   : > { %v1292_v41 = vmul.f32 %v1288_v32, %v1284_v43  ;;  %v1293_v63 = vmul.f32 %v1289_v51, %v1285_v8  ;;  %v1297_v2 = vpop.permute.xlu1 %1296 }
 0x387   : > { %v1301_v46 = vsel %vm1300_vm15, %v1297_v2, %v1299_v1  ;;  %v1302_v48 = vsel %vm1300_vm15, %v1299_v1, %v1297_v2 }
 0x388   : > { %v1294_v38 = vadd.f32 %v1292_v41, %v1224_v7  ;;  %v1295_v25 = vadd.f32 %v1293_v63, %v1225_v54  ;;  %v1307_v56 = vrot.slane %v1301_v46, 4  ;;  %v1308_v35 = vrot.slane %v1302_v48, 4  ;;  %v1342_v7 = vld [vmem:[#allocation5 + $0xc8] sm:$0x3]  ;;  %v1337_v54 = vpop.permute.xlu0 %1336 }
 0x38a   : > { %v1311_v49 = vmul.f32 %v1307_v56, %v1303_v31  ;;  %v1312_v24 = vmul.f32 %v1308_v35, %v1304_v50  ;;  %v1265_v62 = vpop.permute.xlu1 %1264 }
 0x38b   : > { %v1269_v37 = vsel %vm1268_vm0, %v1265_v62, %v1267_v58  ;;  %v1270_v29 = vsel %vm1268_vm0, %v1267_v58, %v1265_v62 }
 0x38c   : > { %v1313_v33 = vadd.f32 %v1311_v49, %v1243_v36  ;;  %v1314_v53 = vadd.f32 %v1312_v24, %v1244_v5  ;;  %v1273_v61 = vmul.f32 %v1271_v42, %v1269_v37  ;;  %v1274_v28 = vmul.f32 %v1272_v45, %v1270_v29 }
 0x38d   : > { %v1349_v36 = vrot.slane %v1294_v38, 2  ;;  %v1350_v5 = vrot.slane %v1295_v25, 2 }
 0x38e   : > { %v1361_v26 = vadd.f32 %v1357_v52, %v1313_v33  ;;  %v1362_v22 = vadd.f32 %v1358_v60, %v1314_v53  ;;  %v1275_v21 = vadd.f32 %v1273_v61, %v1205_v34  ;;  %v1276_v6 = vadd.f32 %v1274_v28, %v1206_v23  ;;  %v1335_v40 = vpop.permute.xlu1 %1334 }
 0x38f   : > { %v1339_v3 = vsel %vm1338_vm1, %v1335_v40, %v1337_v54  ;;  %v1340_v57 = vsel %vm1338_vm1, %v1337_v54, %v1335_v40 }
 0x390   : > { %v1343_v9 = vmul.f32 %v1341_v47, %v1339_v3  ;;  %v1344_v30 = vmul.f32 %v1342_v7, %v1340_v57  ;;  %v1365_v27 = vrot.slane %v1361_v26, 4  ;;  %v1366_v11 = vrot.slane %v1362_v22, 4 }
 0x392   : > { %v1345_v20 = vadd.f32 %v1343_v9, %v1275_v21  ;;  %v1346_v55 = vadd.f32 %v1344_v30, %v1276_v6 }
 0x394   : > { %v1353_v59 = vadd.f32 %v1349_v36, %v1345_v20  ;;  %v1354_v44 = vadd.f32 %v1350_v5, %v1346_v55 }
 0x396   : > { %v1369_v1 = vadd.f32 %v1365_v27, %v1353_v59  ;;  %v1370_v34 = vadd.f32 %v1366_v11, %v1354_v44 }
 0x398   : > { %v1372_v23 = vsel %vm1371_vm2, %v1369_v1, 0.0  ;;  %v1379_v39 = vsel %vm1371_vm2, %v1370_v34, 0.0 }
 0x399   : > { %v1373_v43 = vrot.slane %v1372_v23, 4  ;;  %v1380_v8 = vrot.slane %v1379_v39, 4 }
 0x39b   : > { %v1374_v17 = vadd.f32 %v1373_v43, %v1372_v23  ;;  %v1381_v13 = vadd.f32 %v1380_v8, %v1379_v39 }
 0x39d   : > { %v1375_v10 = vrot.slane %v1374_v17, 2  ;;  %v1382_v32 = vrot.slane %v1381_v13, 2 }
 0x39f   : > { %v1376_v51 = vadd.f32 %v1375_v10, %v1374_v17  ;;  %v1383_v41 = vadd.f32 %v1382_v32, %v1381_v13 }
 0x3a1   : > { %v1377_v63 = vrot.slane %v1376_v51, 1  ;;  %v1384_v2 = vrot.slane %v1383_v41, 1 }
 0x3a3   : > { %v1378_v31 = vadd.f32 %v1377_v63, %v1376_v51  ;;  %v1385_v50 = vadd.f32 %v1384_v2, %v1383_v41 }
 0x3a5   : > { %vm1386_vm3 = vcmp.ge.f32.partialorder %v1378_v31, 0.0  ;;  %vm1387_vm4 = vcmp.ge.f32.partialorder %v1385_v50, 0.0  ;;  %v1388_v46 = vmul.f32 0.1, %v1378_v31  ;;  %v1389_v48 = vmul.f32 0.1, %v1385_v50 }
 0x3a7   : > { %v1390_v58 = vsel %vm1386_vm3, %v1378_v31, %v1388_v46  ;;  %v1391_v38 = vsel %vm1387_vm4, %v1385_v50, %v1389_v48 }
 0x3a8   : > { %v1532_v25 = vmul.f32 -1.442695, %v1390_v58  ;;  %v1533_v56 = vmul.f32 -1.442695, %v1391_v38 }
 0x3aa   : > { %1668 = vpow2.f32 %v1532_v25 }
 0x3ab   : > { %1670 = vpow2.f32 %v1533_v56 }
 0x3b4   : > { %v1669_v35 = vpop.eup %1668 }
 0x3b5   : > { %v1671_v42 = vpop.eup %1670  ;;  %v1398_v45 = vadd.f32 1.0, %v1669_v35 }
 0x3b6   : > { %v1399_v49 = vadd.f32 1.0, %v1671_v42 }
 0x3b7   : > { %1672 = vrcp.f32 %v1398_v45 }
 0x3b8   : > { %1674 = vrcp.f32 %v1399_v49 }
 0x3c1   : > { %v1673_v24 = vpop.eup %1672 }
 0x3c2   : > { %v1675_v62 = vpop.eup %1674  ;;  %v1404_v52 = vmul.f32 %v1673_v24, %v2149_v15  ;;  %v1406_v60 = vmul.f32 %v1673_v24, %v2143_v12  ;;  %v1408_v37 = vmul.f32 %v1673_v24, %v2155_v18  ;;  %v1410_v29 = vmul.f32 %v1673_v24, %v2167_v4 }
 0x3c3   : > { %v1405_v33 = vmul.f32 %v1675_v62, %v2152_v16  ;;  %v1407_v53 = vmul.f32 %v1675_v62, %v2146_v14  ;;  %v1409_v61 = vmul.f32 %v1675_v62, %v2158_v19  ;;  %v1411_v15 = vmul.f32 %v1675_v62, %v2170_v0 }
 0x3c4   : > { %1412 = vst [vmem:[%s284_s11] sm:$0xff] %v1404_v52  ;;  %1414 = vst [vmem:[%s284_s11 + $0x10] sm:$0xff] %v1406_v60 }
 0x3c5   : > { %1416 = vst [vmem:[%s284_s11 + $0x20] sm:$0xff] %v1408_v37  ;;  %1418 = vst [vmem:[%s284_s11 + $0x30] sm:$0xff] %v1410_v29 }
 0x3c6   : > { %1413 = vst [vmem:[%s284_s11 + $0x8] sm:$0xff] %v1405_v33  ;;  %1415 = vst [vmem:[%s284_s11 + $0x18] sm:$0xff] %v1407_v53 }
 0x3c7   : > { %1417 = vst [vmem:[%s284_s11 + $0x28] sm:$0xff] %v1409_v61  ;;  %1419 = vst [vmem:[%s284_s11 + $0x38] sm:$0xff] %v1411_v15 }
 0x3c8   : > { %1747 = shalt.err (!%p1744_p7)
}
 0x3c9   : > { %s1748_s15 = scalar_lea.hbm %s2500_s26, 1024  ;;  %s1752_s7 = scalar_lea.hbm %s2557_s6, 2048 }
 0x3ca   : > { %p1749_p9 = scmp.ne.s32.totalorder %s2500_s26, %s1748_s15  ;;  %p1753_p5 = scmp.lt.u32.totalorder %s2500_s26, %s2557_s6 }
 0x3cb   : > { %p1754_p11 = scmp.lt.u32.totalorder %s1752_s7, %s1748_s15  ;;  %p1756_p4 = scmp.lt.u32.totalorder %s1748_s15, %s2500_s26 }
 0x3cc   : > { %p1750_p1 = pnand %p1749_p9, %p1990_p12 }
 0x3cd   : > { %p1755_p2 = por %p1754_p11, %p1753_p5 }
 0x3ce   : > { %p1751_p0 = pneg %p1750_p1 }
 0x3cf   : > { %p1757_p6 = por %p1756_p4, %p1755_p2 }
 0x3d1   : > { %p1758_p8 = pnand %p1757_p6, %p1751_p0 }
 0x3d3   : > { %1761 = shalt.err (!%p1758_p8)
}
 0x3d4   : > { %s1860_s20 = smov 256  }
 0x3d5   : > { %1547 = dma.vmem_to_hbm [thread:$0]  (%p1990_p12), %s2506_s27, 1024, %s2500_s26, %s1421_s25, %s1860_s20, %s1860_s20, %s1828_s19  }
 0x3d6 PF: > { %s1449_s17 = sand.u32 1, %s1792_s21   ;;  %p2572_p10 = scmp.ne.s32.totalorder %s2562_s28, 0 }
 0x3d7   : > { %p2573_p13 = scmp.ge.s32.totalorder %s1804_s24, 2  ;;  %s1450_s10 = scalar_lea.sflag [#allocation4], %s1449_s17 }
 0x3d9   : > { %p1558_p3 = pnand %p2573_p13, %p2572_p10 }
 0x3db   : > { %1787 = dma.done.wait (!%p1558_p3), %s1450_s10, 1024  }
 0x3dc   : > { %1789 = vsyncadd (!%p1558_p3), %s1450_s10, 4294966272  ;;  %p20_p7 = scmp.ge.s32.totalorder %s1952_s9, 4   ;;  %s2574_s21 = smov %s1796_s22 }
 0x3dd   : > { %s2575_s22 = smov %s1800_s23  ;;  %s2576_s23 = smov %s1986_s13 }
 0x3de   : > { %s2577_s24 = smov %s1952_s9  ;;  %22 = sbr.rel (!%p20_p7) target bundleno = 6 (0x6), region = 93 }
 0x3e5   :  { %1455 = vsyncpa [#allocation3], 1 }
 0x3e6   :  { %1457 = vsyncpa [#allocation3 + $0x1], 1 }
 0x3e7   :  { %1458 = vsyncpa [#allocation6], 1 }
 0x3e8   :  { %1459 = vsyncpa [#allocation4], 1 }
 0x3e9   :  { %1461 = vsyncpa [#allocation4 + $0x1], 1 }

</bundles_post_ra>
